<compile_context>
chip_gen: v6e
topology: v6e:2x2x1
jax: 0.10.0
libtpu: 0.0.40
codegen_flags: <defaults>
</compile_context>

<pallas_src>
import jax
import jax.numpy as jnp
import numpy as np
from jax.experimental import pallas as pl
from jax.experimental.pallas import tpu as pltpu

NEG_SLOPE = 0.01                    # nn.LeakyReLU() default negative_slope
BN_EPS = 1e-5                       # nn.BatchNorm2d() default eps
VMEM_LIMIT = 48 * 1024 * 1024       # below v7x physical (64 MiB), raises v5e/v6e default


def _phase_tap_matrix(stride):
    """M[r, dh+1, di+1] = 1 iff floor((r + di) / stride) == dh, di/dh in {-1,0,1}.

    Encodes how a 3x3 tap at upsampled offset di maps onto offset dh of the
    original-resolution image for output phase r (nearest-neighbour upsample)."""
    M = np.zeros((stride, 3, 3), np.float32)
    for r in range(stride):
        for di in (-1, 0, 1):
            dh = (r + di) // stride
            M[r, dh + 1, di + 1] = 1.0
    return jnp.asarray(M)


def _divisors_desc(n):
    return [d for d in range(n, 0, -1) if n % d == 0]


def _pick_th(H, W, Cin, Cp, budget_bytes=20 * 1024 * 1024):
    """Largest H-tile whose live VMEM (with layout padding + double buffering)
    fits the budget; prefer >= 2 tiles so the pipeline / megacore has work."""
    pad = lambda v, m: -(-v // m) * m
    def est(t):
        in_t = (t + 2) * pad(W + 2, 16) * pad(Cin, 128) * 2        # bf16 halo tile
        y_t = pad(t * W, 16) * pad(Cp, 128) * 2                    # bf16 out tile
        w_t = pad(9 * Cin, 16) * pad(Cp, 128) * 2                  # resident weights
        slab = pad(t * W, 16) * pad(9 * Cin, 128) * 2              # im2col slab
        acc = pad(t * W, 8) * pad(Cp, 128) * 4                     # f32 dot result
        return 2 * in_t + 2 * y_t + w_t + slab + acc
    cands = [t for t in _divisors_desc(H) if ((t * W) % 8 == 0 or t == H)]
    good = [t for t in cands if est(t) <= budget_bytes]
    prefer = [t for t in good if H // t >= 2 and t >= min(8, H)]
    if prefer:
        return prefer[0]
    if good:
        return good[0]
    return cands[-1] if cands else 1


def _pick_rows(R, row_bytes, budget_bytes=16 * 1024 * 1024):
    """Row-tile for the elementwise pass: big blocks, >= 4 parallel steps."""
    cands = [t for t in _divisors_desc(R) if (t % 8 == 0 or t == R)]
    good = [t for t in cands if t * row_bytes <= budget_bytes]
    prefer = [t for t in good if R // t >= 4 and t >= min(8, R)]
    for lst in (prefer, good, cands[-1:]):
        if lst:
            return lst[0]
    return R


def _upconv_kernel(xt_ref, w_ref, y_ref, s1_ref, s2_ref):
    """Fused nearest-upsample + 3x3 conv (+ BN partial stats), one (n, h-tile) block.

    xt_ref: (1, 1, tH+2, W+2, Cin)  bf16 halo tile of the ORIGINAL-resolution input
    w_ref:  (9*Cin, Cp)             bf16 folded phase-packed weights, Cp = s*s*Cout
    y_ref:  (1, tH*W, Cp)           bf16 phase-packed conv output
    s1_ref: (1, 1, Cp)              f32 partial sum            (for BN)
    s2_ref: (1, 1, Cp)              f32 partial sum of squares (for BN)
    """
    _, _, tHp2, Wp2, Cin = xt_ref.shape
    tH, W = tHp2 - 2, Wp2 - 2
    Cp = y_ref.shape[-1]

    # im2col: concatenate the 9 shifted taps along K so the MXU sees one
    # contraction of depth 9*Cin instead of 9 tiny K=Cin dots.
    cols = []
    for dy in range(3):
        for dx in range(3):
            cols.append(xt_ref[0, 0, dy:dy + tH, dx:dx + W, :].reshape(tH * W, Cin))
    slab = jnp.concatenate(cols, axis=-1)                       # (tH*W, 9*Cin) bf16

    y = jnp.dot(slab, w_ref[...], preferred_element_type=jnp.float32)  # f32 (tH*W, Cp)

    y_ref[...] = y.reshape(1, tH * W, Cp).astype(y_ref.dtype)
    s1_ref[...] = jnp.sum(y, axis=0, keepdims=True).reshape(1, 1, Cp)
    s2_ref[...] = jnp.sum(y * y, axis=0, keepdims=True).reshape(1, 1, Cp)


def _bn_lrelu_kernel(y_ref, scale_ref, shift_ref, o_ref):
    """Elementwise BatchNorm apply (precomputed scale/shift) + LeakyReLU (f32 math)."""
    z = y_ref[...].astype(jnp.float32) * scale_ref[...] + shift_ref[...]
    o_ref[...] = jnp.where(z >= 0, z, NEG_SLOPE * z).astype(o_ref.dtype)


def conv_up_bn_relu(x_nchw, w_oihw, bias, gamma, beta, *, stride=1):
    """Forward pass of ConvUpBNReLU (training-mode BatchNorm). Returns NCHW f32."""
    # A conv bias added right before training-mode BatchNorm cancels exactly
    # (it shifts the batch mean by the same amount), so it is dropped here.
    del bias

    N, Cin, H, W = x_nchw.shape
    Cout = w_oihw.shape[0]
    s = int(stride)
    Cp = s * s * Cout
    Hu, Wu = H * s, W * s

    # ---- host-side prep: ORIGINAL resolution / parameter-sized tensors only ----
    x_nhwc = jnp.transpose(x_nchw, (0, 2, 3, 1)).astype(jnp.float32)
    xpad = jnp.pad(x_nhwc, ((0, 0), (1, 1), (1, 1), (0, 0))).astype(jnp.bfloat16)

    tH = _pick_th(H, W, Cin, Cp)
    nH = H // tH
    # Pre-tiled halo view of the small padded input: (N, nH, tH+2, W+2, Cin).
    # (Only 2 duplicated rows per tile; avoids overlapping-block index_maps.)
    x_tiles = jnp.stack([xpad[:, i * tH:i * tH + tH + 2] for i in range(nH)], axis=1)

    # Effective phase-packed weights: upsample(s) + 3x3/pad-1 conv == s*s convs on
    # the original input with per-phase summed taps.  Flattened to (9*Cin, Cp) for
    # a single MXU contraction; Cp column order is (r, q, cout), cout fastest.
    w_hwio = jnp.transpose(w_oihw, (2, 3, 1, 0)).astype(jnp.float32)      # (3,3,Cin,Cout)
    M = _phase_tap_matrix(s)                                              # (s,3,3)
    w_eff = jnp.einsum('rad,qce,deio->acirqo', M, M, w_hwio)              # (3,3,Cin,s,s,Cout)
    w_flat = w_eff.reshape(9 * Cin, Cp).astype(jnp.bfloat16)

    # ---- Pallas kernel 1: fused upsample+conv + BN partial statistics ----------
    conv_cost = pl.CostEstimate(
        flops=2 * N * H * W * 9 * Cin * Cp,
        transcendentals=0,
        bytes_accessed=int(x_tiles.size * 2 + w_flat.size * 2
                           + N * H * W * Cp * 2 + 2 * N * nH * Cp * 4))

    y_packed, psum, psumsq = pl.pallas_call(
        _upconv_kernel,
        out_shape=(
            jax.ShapeDtypeStruct((N, H * W, Cp), jnp.bfloat16),
            jax.ShapeDtypeStruct((N * nH, 1, Cp), jnp.float32),
            jax.ShapeDtypeStruct((N * nH, 1, Cp), jnp.float32),
        ),
        grid=(N, nH),
        in_specs=[
            pl.BlockSpec((1, 1, tH + 2, W + 2, Cin), lambda n, h: (n, h, 0, 0, 0)),
            pl.BlockSpec((9 * Cin, Cp), lambda n, h: (0, 0)),       # resident weights
        ],
        out_specs=(
            pl.BlockSpec((1, tH * W, Cp), lambda n, h: (n, h, 0)),
            pl.BlockSpec((1, 1, Cp), lambda n, h: (n * nH + h, 0, 0)),
            pl.BlockSpec((1, 1, Cp), lambda n, h: (n * nH + h, 0, 0)),
        ),
        compiler_params=pltpu.CompilerParams(
            dimension_semantics=("parallel", "parallel"),
            vmem_limit_bytes=VMEM_LIMIT),
        cost_estimate=conv_cost,
    )(x_tiles, w_flat)

    # ---- tiny BN statistics reduction (N*nH * s*s * Cout values) ---------------
    cnt = float(N * Hu * Wu)
    sum_c = jnp.sum(psum.reshape(N * nH, s * s, Cout), axis=(0, 1))
    sumsq_c = jnp.sum(psumsq.reshape(N * nH, s * s, Cout), axis=(0, 1))
    mean = sum_c / cnt
    var = jnp.maximum(sumsq_c / cnt - mean * mean, 0.0)          # biased batch var
    inv = jax.lax.rsqrt(var + BN_EPS)
    scale_c = gamma.astype(jnp.float32) * inv
    shift_c = beta.astype(jnp.float32) - mean * scale_c
    # Broadcast onto the packed lane layout: lane = x*Cp + phase*Cout + cout.
    scale_row = jnp.tile(scale_c, W * s * s).reshape(1, W * Cp)
    shift_row = jnp.tile(shift_c, W * s * s).reshape(1, W * Cp)

    # ---- Pallas kernel 2: lane-dense, tiled BN apply + LeakyReLU ---------------
    R = N * H
    y_rows = y_packed.reshape(R, W * Cp)          # free row-major reshape, 128+ lanes
    tR = _pick_rows(R, row_bytes=12 * W * Cp)
    out_rows = pl.pallas_call(
        _bn_lrelu_kernel,
        out_shape=jax.ShapeDtypeStruct((R, W * Cp), jnp.float32),
        grid=(R // tR,),
        in_specs=[
            pl.BlockSpec((tR, W * Cp), lambda r: (r, 0)),
            pl.BlockSpec((1, W * Cp), lambda r: (0, 0)),
            pl.BlockSpec((1, W * Cp), lambda r: (0, 0)),
        ],
        out_specs=pl.BlockSpec((tR, W * Cp), lambda r: (r, 0)),
        compiler_params=pltpu.CompilerParams(
            dimension_semantics=("parallel",),
            vmem_limit_bytes=VMEM_LIMIT),
    )(y_rows, scale_row, shift_row)

    # ---- phase unpack: (N, H, W, s, s, Cout) -> NCHW (N, Cout, Hu, Wu) ---------
    # TODO(synk): fuse this phase-unpack transpose into kernel 2 once the required
    # general N-D relayout lowers reliably in Mosaic; kept as a single XLA
    # transpose over the final f32 output for now.
    out = out_rows.reshape(N, H, W, s, s, Cout)
    out = jnp.transpose(out, (0, 5, 1, 3, 2, 4)).reshape(N, Cout, Hu, Wu)
    return out


def _reference(x, w, b, gamma, beta, stride):
    """Pure-JAX reference matching the PyTorch forward (training-mode BN)."""
    xu = jnp.repeat(jnp.repeat(x, stride, axis=2), stride, axis=3)
    y = jax.lax.conv_general_dilated(
        xu, w, window_strides=(1, 1), padding="SAME",
        dimension_numbers=("NCHW", "OIHW", "NCHW"),
        precision=jax.lax.Precision.HIGHEST) + b[None, :, None, None]
    mean = jnp.mean(y, axis=(0, 2, 3), keepdims=True)
    var = jnp.mean((y - mean) ** 2, axis=(0, 2, 3), keepdims=True)
    z = (y - mean) / jnp.sqrt(var + BN_EPS)
    z = z * gamma[None, :, None, None] + beta[None, :, None, None]
    return jnp.where(z >= 0, z, NEG_SLOPE * z)


if __name__ == "__main__":
    nin, nout, stride = 4, 8, 2
    key = jax.random.PRNGKey(0)
    kx, kw, kb = jax.random.split(key, 3)

    x = jax.random.normal(kx, (2, nin, 16, 16), jnp.float32)
    w = jax.random.normal(kw, (nout, nin, 3, 3), jnp.float32) * 0.1
    b = jax.random.normal(kb, (nout,), jnp.float32) * 0.1
    gamma = jnp.ones((nout,), jnp.float32)
    beta = jnp.zeros((nout,), jnp.float32)

    out = conv_up_bn_relu(x, w, b, gamma, beta, stride=stride)
    out = jax.block_until_ready(out)
    assert out.shape == (2, nout, 16 * stride, 16 * stride), out.shape

    ref = _reference(x, w, b, gamma, beta, stride)
    # bf16 MXU inputs and a bf16 inter-kernel activation inject ~1e-2 absolute
    # error on O(1) post-BN values; a loose tolerance still catches any
    # indexing / phase-packing / normalization bug.
    max_err = float(jnp.max(jnp.abs(out - ref)))
    assert max_err < 0.1, f"max abs error {max_err}"
    print("KERNEL_OK")
</pallas_src>

<mosaic_0001>
module attributes {stable_mosaic.version = 11 : i64} {
  func.func @_upconv_kernel(%arg0: i32, %arg1: i32, %arg2: memref<1x1x10x18x4xbf16, #tpu.memory_space<vmem>>, %arg3: memref<36x32xbf16, #tpu.memory_space<vmem>>, %arg4: memref<1x128x32xbf16, #tpu.memory_space<vmem>>, %arg5: memref<1x1x32xf32, #tpu.memory_space<vmem>>, %arg6: memref<1x1x32xf32, #tpu.memory_space<vmem>>) attributes {dimension_semantics = [#tpu.dimension_semantics<parallel>, #tpu.dimension_semantics<parallel>], iteration_bounds = array<i64: 2, 2>, scalar_prefetch = 0 : i64, scratch_operands = 0 : i64, tpu.core_type = #tpu.core_type<tc>, window_params = [{transform_indices = @transform_0, window_bounds = array<i64: 1, 1, 10, 18, 4>}, {pipeline_mode = #tpu.pipeline_mode<synchronous>, transform_indices = @transform_1, window_bounds = array<i64: 36, 32>}, {transform_indices = @transform_2, window_bounds = array<i64: 1, 128, 32>}, {transform_indices = @transform_3, window_bounds = array<i64: 1, 1, 32>}, {transform_indices = @transform_4, window_bounds = array<i64: 1, 1, 32>}]} {
    %c0 = arith.constant 0 : index
    %c0_0 = arith.constant 0 : index
    %c0_1 = arith.constant 0 : index
    %c0_2 = arith.constant 0 : index
    %c0_3 = arith.constant 0 : index
    %0 = vector.load %arg2[%c0, %c0_0, %c0_1, %c0_2, %c0_3] : memref<1x1x10x18x4xbf16, #tpu.memory_space<vmem>>, vector<1x1x8x16x4xbf16>
    %1 = vector.shape_cast %0 : vector<1x1x8x16x4xbf16> to vector<8x16x4xbf16>
    %2 = vector.shape_cast %1 : vector<8x16x4xbf16> to vector<128x4xbf16>
    %c0_4 = arith.constant 0 : index
    %c0_5 = arith.constant 0 : index
    %c0_6 = arith.constant 0 : index
    %c1 = arith.constant 1 : index
    %c0_7 = arith.constant 0 : index
    %3 = vector.load %arg2[%c0_4, %c0_5, %c0_6, %c1, %c0_7] : memref<1x1x10x18x4xbf16, #tpu.memory_space<vmem>>, vector<1x1x8x16x4xbf16>
    %4 = vector.shape_cast %3 : vector<1x1x8x16x4xbf16> to vector<8x16x4xbf16>
    %5 = vector.shape_cast %4 : vector<8x16x4xbf16> to vector<128x4xbf16>
    %c0_8 = arith.constant 0 : index
    %c0_9 = arith.constant 0 : index
    %c0_10 = arith.constant 0 : index
    %c2 = arith.constant 2 : index
    %c0_11 = arith.constant 0 : index
    %6 = vector.load %arg2[%c0_8, %c0_9, %c0_10, %c2, %c0_11] : memref<1x1x10x18x4xbf16, #tpu.memory_space<vmem>>, vector<1x1x8x16x4xbf16>
    %7 = vector.shape_cast %6 : vector<1x1x8x16x4xbf16> to vector<8x16x4xbf16>
    %8 = vector.shape_cast %7 : vector<8x16x4xbf16> to vector<128x4xbf16>
    %c0_12 = arith.constant 0 : index
    %c0_13 = arith.constant 0 : index
    %c1_14 = arith.constant 1 : index
    %c0_15 = arith.constant 0 : index
    %c0_16 = arith.constant 0 : index
    %9 = vector.load %arg2[%c0_12, %c0_13, %c1_14, %c0_15, %c0_16] : memref<1x1x10x18x4xbf16, #tpu.memory_space<vmem>>, vector<1x1x8x16x4xbf16>
    %10 = vector.shape_cast %9 : vector<1x1x8x16x4xbf16> to vector<8x16x4xbf16>
    %11 = vector.shape_cast %10 : vector<8x16x4xbf16> to vector<128x4xbf16>
    %c0_17 = arith.constant 0 : index
    %c0_18 = arith.constant 0 : index
    %c1_19 = arith.constant 1 : index
    %c1_20 = arith.constant 1 : index
    %c0_21 = arith.constant 0 : index
    %12 = vector.load %arg2[%c0_17, %c0_18, %c1_19, %c1_20, %c0_21] : memref<1x1x10x18x4xbf16, #tpu.memory_space<vmem>>, vector<1x1x8x16x4xbf16>
    %13 = vector.shape_cast %12 : vector<1x1x8x16x4xbf16> to vector<8x16x4xbf16>
    %14 = vector.shape_cast %13 : vector<8x16x4xbf16> to vector<128x4xbf16>
    %c0_22 = arith.constant 0 : index
    %c0_23 = arith.constant 0 : index
    %c1_24 = arith.constant 1 : index
    %c2_25 = arith.constant 2 : index
    %c0_26 = arith.constant 0 : index
    %15 = vector.load %arg2[%c0_22, %c0_23, %c1_24, %c2_25, %c0_26] : memref<1x1x10x18x4xbf16, #tpu.memory_space<vmem>>, vector<1x1x8x16x4xbf16>
    %16 = vector.shape_cast %15 : vector<1x1x8x16x4xbf16> to vector<8x16x4xbf16>
    %17 = vector.shape_cast %16 : vector<8x16x4xbf16> to vector<128x4xbf16>
    %c0_27 = arith.constant 0 : index
    %c0_28 = arith.constant 0 : index
    %c2_29 = arith.constant 2 : index
    %c0_30 = arith.constant 0 : index
    %c0_31 = arith.constant 0 : index
    %18 = vector.load %arg2[%c0_27, %c0_28, %c2_29, %c0_30, %c0_31] : memref<1x1x10x18x4xbf16, #tpu.memory_space<vmem>>, vector<1x1x8x16x4xbf16>
    %19 = vector.shape_cast %18 : vector<1x1x8x16x4xbf16> to vector<8x16x4xbf16>
    %20 = vector.shape_cast %19 : vector<8x16x4xbf16> to vector<128x4xbf16>
    %c0_32 = arith.constant 0 : index
    %c0_33 = arith.constant 0 : index
    %c2_34 = arith.constant 2 : index
    %c1_35 = arith.constant 1 : index
    %c0_36 = arith.constant 0 : index
    %21 = vector.load %arg2[%c0_32, %c0_33, %c2_34, %c1_35, %c0_36] : memref<1x1x10x18x4xbf16, #tpu.memory_space<vmem>>, vector<1x1x8x16x4xbf16>
    %22 = vector.shape_cast %21 : vector<1x1x8x16x4xbf16> to vector<8x16x4xbf16>
    %23 = vector.shape_cast %22 : vector<8x16x4xbf16> to vector<128x4xbf16>
    %c0_37 = arith.constant 0 : index
    %c0_38 = arith.constant 0 : index
    %c2_39 = arith.constant 2 : index
    %c2_40 = arith.constant 2 : index
    %c0_41 = arith.constant 0 : index
    %24 = vector.load %arg2[%c0_37, %c0_38, %c2_39, %c2_40, %c0_41] : memref<1x1x10x18x4xbf16, #tpu.memory_space<vmem>>, vector<1x1x8x16x4xbf16>
    %25 = vector.shape_cast %24 : vector<1x1x8x16x4xbf16> to vector<8x16x4xbf16>
    %26 = vector.shape_cast %25 : vector<8x16x4xbf16> to vector<128x4xbf16>
    %27 = tpu.concatenate %2, %5, %8, %11, %14, %17, %20, %23, %26 in 1 : vector<128x4xbf16>, vector<128x4xbf16>, vector<128x4xbf16>, vector<128x4xbf16>, vector<128x4xbf16>, vector<128x4xbf16>, vector<128x4xbf16>, vector<128x4xbf16>, vector<128x4xbf16> -> vector<128x36xbf16>
    %c0_42 = arith.constant 0 : index
    %c0_43 = arith.constant 0 : index
    %28 = vector.load %arg3[%c0_42, %c0_43] : memref<36x32xbf16, #tpu.memory_space<vmem>>, vector<36x32xbf16>
    %cst = arith.constant dense<0.000000e+00> : vector<128x32xf32>
    %29 = tpu.matmul %27, %28, %cst {dimension_numbers = #tpu.dot_dimension_numbers<[1], [0], [0], [1], [0, 0, 1, 1], [], []>} : vector<128x36xbf16>, vector<36x32xbf16>, vector<128x32xf32> -> vector<128x32xf32>
    %30 = vector.shape_cast %29 : vector<128x32xf32> to vector<1x128x32xf32>
    %31 = arith.truncf %30 : vector<1x128x32xf32> to vector<1x128x32xbf16>
    %c0_44 = arith.constant 0 : index
    %c0_45 = arith.constant 0 : index
    %c0_46 = arith.constant 0 : index
    %32 = vector.load %arg4[%c0_44, %c0_45, %c0_46] : memref<1x128x32xbf16, #tpu.memory_space<vmem>>, vector<1x128x32xbf16>
    tpu.vector_store %arg4[%c0_44, %c0_45, %c0_46], %31 {strides = array<i32>} : memref<1x128x32xbf16, #tpu.memory_space<vmem>>, vector<1x128x32xbf16>,
    %cst_47 = arith.constant dense<0.000000e+00> : vector<32xf32>
    %33 = vector.multi_reduction <add>, %29, %cst_47 [0] : vector<128x32xf32> to vector<32xf32>
    %34 = vector.shape_cast %33 : vector<32xf32> to vector<1x32xf32>
    %35 = vector.shape_cast %34 : vector<1x32xf32> to vector<1x1x32xf32>
    %c0_48 = arith.constant 0 : index
    %c0_49 = arith.constant 0 : index
    %c0_50 = arith.constant 0 : index
    %36 = vector.load %arg5[%c0_48, %c0_49, %c0_50] : memref<1x1x32xf32, #tpu.memory_space<vmem>>, vector<1x1x32xf32>
    tpu.vector_store %arg5[%c0_48, %c0_49, %c0_50], %35 {strides = array<i32>} : memref<1x1x32xf32, #tpu.memory_space<vmem>>, vector<1x1x32xf32>,
    %37 = arith.mulf %29, %29 : vector<128x32xf32>
    %cst_51 = arith.constant dense<0.000000e+00> : vector<32xf32>
    %38 = vector.multi_reduction <add>, %37, %cst_51 [0] : vector<128x32xf32> to vector<32xf32>
    %39 = vector.shape_cast %38 : vector<32xf32> to vector<1x32xf32>
    %40 = vector.shape_cast %39 : vector<1x32xf32> to vector<1x1x32xf32>
    %c0_52 = arith.constant 0 : index
    %c0_53 = arith.constant 0 : index
    %c0_54 = arith.constant 0 : index
    %41 = vector.load %arg6[%c0_52, %c0_53, %c0_54] : memref<1x1x32xf32, #tpu.memory_space<vmem>>, vector<1x1x32xf32>
    tpu.vector_store %arg6[%c0_52, %c0_53, %c0_54], %40 {strides = array<i32>} : memref<1x1x32xf32, #tpu.memory_space<vmem>>, vector<1x1x32xf32>,
    return
  }
  func.func @transform_0(%arg0: i32, %arg1: i32) -> (i32, i32, i32, i32, i32) {
    %c0_i32 = arith.constant 0 : i32
    %c0_i32_0 = arith.constant 0 : i32
    %c0_i32_1 = arith.constant 0 : i32
    %c0_i32_2 = arith.constant 0 : i32
    return %arg0, %arg1, %c0_i32, %c0_i32_0, %c0_i32_1 : i32, i32, i32, i32, i32
  }
  func.func @transform_1(%arg0: i32, %arg1: i32) -> (i32, i32) {
    %c0_i32 = arith.constant 0 : i32
    %c0_i32_0 = arith.constant 0 : i32
    %c0_i32_1 = arith.constant 0 : i32
    return %c0_i32, %c0_i32_0 : i32, i32
  }
  func.func @transform_2(%arg0: i32, %arg1: i32) -> (i32, i32, i32) {
    %c0_i32 = arith.constant 0 : i32
    %c0_i32_0 = arith.constant 0 : i32
    return %arg0, %arg1, %c0_i32 : i32, i32, i32
  }
  func.func @transform_3(%arg0: i32, %arg1: i32) -> (i32, i32, i32) {
    %c2_i32 = arith.constant 2 : i32
    %0 = arith.muli %arg0, %c2_i32 : i32
    %1 = arith.addi %0, %arg1 : i32
    %c0_i32 = arith.constant 0 : i32
    %c0_i32_0 = arith.constant 0 : i32
    %c0_i32_1 = arith.constant 0 : i32
    return %1, %c0_i32, %c0_i32_0 : i32, i32, i32
  }
  func.func @transform_4(%arg0: i32, %arg1: i32) -> (i32, i32, i32) {
    %c2_i32 = arith.constant 2 : i32
    %0 = arith.muli %arg0, %c2_i32 : i32
    %1 = arith.addi %0, %arg1 : i32
    %c0_i32 = arith.constant 0 : i32
    %c0_i32_0 = arith.constant 0 : i32
    %c0_i32_1 = arith.constant 0 : i32
    return %1, %c0_i32, %c0_i32_0 : i32, i32, i32
  }
}

</mosaic_0001>

<bundles_post_ra>
// kernel: tpu_custom_call.1
= control target key start
LH: loop header
LB: loop body
LE: loop exit
PB: predicated region body
PF: predicated region fallthrough
CT: control target
= control target key end

     0   :  { %10 = vsyncpa [#allocation3], 0  ;;  %s3714_s0 = inlined_call_operand.vmem [shape: bf16[2,2,10,18,4], index: 0, kind: input, shape index: {}]   ;;  %s3715_s1 = inlined_call_operand.vmem [shape: bf16[36,32], index: 1, kind: input, shape index: {}]   ;;  %s3716_s2 = inlined_call_operand.vmem [shape: bf16[2,256,32], index: 2, kind: output, shape index: {0}]   ;;  %s3717_s3 = inlined_call_operand.hbm [shape: f32[4,1,32], index: 3, kind: output, shape index: {1}]   ;;  %s3718_s4 = inlined_call_operand.hbm [shape: f32[4,1,32], index: 4, kind: output, shape index: {2}]  }
   0x1   :  { %12 = vsyncpa [#allocation3 + $0x1], 0 }
   0x2   :  { %13 = vsyncpa [#allocation5], 0 }
   0x3   :  { %15 = vsyncpa [#allocation5 + $0x1], 0  ;;  %s2747_s15 = smov 0   ;;  %s2749_s16 = smov 0  }
   0x4   :  { %s2751_s17 = smov 0   ;;  %s2753_s18 = smov 0  }
   0x5   :  { %s2755_s19 = smov 0   ;;  %s2757_s20 = smov 0  }
   0x6   :  { %s2759_s21 = smov 0   ;;  %s2761_s22 = smov 0  }
   0x7 LB: > { %s2202_s23 = sadd.s32 4294967295, %s2710_s22   ;;  %s30_s24 = sadd.s32 1, %s2702_s20  ;;  %s2710_s22 = sphi %s2761_s22, %s21_s22   ;;  %s2706_s21 = sphi %s2759_s21, %s3733_s21   ;;  %s2702_s20 = sphi %s2757_s20, %s3732_s20   ;;  %s2698_s19 = sphi %s2755_s19, %s3731_s19   ;;  %s2694_s18 = sphi %s2753_s18, %s3730_s18   ;;  %s2690_s17 = sphi %s2751_s17, %s3729_s17   ;;  %s2686_s16 = sphi %s2749_s16, %s3728_s16   ;;  %s2682_s15 = sphi %s2747_s15, %s3727_s15  }
   0x8   : > { %s33_s25 = sadd.s32 1, %s2706_s21  ;;  %p31_p0 = scmp.ge.s32.totalorder %s30_s24, 2 }
   0x9   : > { %s2204_s26 = sshll.u32 %s2706_s21, 1  ;;  %s2203_s27 = sadd.s32 4294967294, %s2710_s22  }
   0xa   : > { %s115_s28 = sadd.s32 %s2702_s20, %s2204_s26  ;;  %s3735_s24 = smov (%p31_p0, %s30_s24), 0 }
   0xb   : > { %s3737_s25 = smov (!%p31_p0, %s33_s25), %s2706_s21  ;;  %p131_p1 = scmp.ne.s32.totalorder %s2690_s17, %s2686_s16 }
   0xc   : > { %p132_p2 = scmp.eq.s32.totalorder %s2202_s23, 3  ;;  %p35_p3 = scmp.ge.s32.totalorder %s3737_s25, 2 }
   0xd   : > { %p137_p4 = scmp.ne.s32.totalorder %s2686_s16, %s2682_s15  ;;  %p138_p6 = scmp.eq.s32.totalorder %s2203_s27, 3 }
   0xe   : > { %p2800_p5 = por %p132_p2, %p131_p1  ;;  %s3739_s25 = smov (%p35_p3, %s3737_s25), 0 }
   0xf   : > { %p2806_p7 = por %p138_p6, %p137_p4  ;;  %p2210_p8 = scmp.ge.s32.totalorder %s2710_s22, 1 }
  0x10   : > { %s2205_s5 = sshll.u32 %s3739_s25, 1  ;;  %p201_p9 = scmp.lt.s32.totalorder %s2710_s22, 5 }
  0x11   : > { %s117_s6 = sadd.s32 %s2205_s5, %s3735_s24  ;;  %s121_s7 = sadd.s32 1, %s2690_s17 }
  0x12   : > { %s118_s8 = ssub.s32 %s115_s28, %s117_s6  ;;  %p202_p10 = pnand %p2210_p8, %p201_p9 }
  0x13   : > { %p119_p11 = scmp.eq.s32.totalorder %s118_s8, 0  ;;  %p243_p12 = scmp.lt.s32.totalorder (!%p202_p10), %s2698_s19, 1 }
  0x14   : > { %205 = sbr.rel (%p202_p10) target bundleno = 558 (0x22e), region = 28  ;;  %p245_p13 = scmp.lt.s32.totalorder (!%p202_p10), %s2694_s18, 1 }
  0x15   : > { %s2816_s9 = scalar_select %p119_p11, %s2690_s17, %s121_s7  }
  0x16   : > { %s2712_s5 = smov (!%p202_p10), 12   ;;  %s2713_s6 = smov (!%p202_p10), 24  }
  0x17   : > { %s2714_s7 = smov (!%p202_p10), 20   ;;  %s2715_s8 = smov (!%p202_p10), 8  }
  0x18   : > { %s2402_s26 = sshll.u32 (!%p202_p10), %s2698_s19, 1 }
  0x19   : > { %s2821_s10 = scalar_select %p243_p12, %s2698_s19, 1  ;;  %vm518_vm0 = vcmask 1042432   ;;  %vm519_vm1 = vcmask 1046532   ;;  %vm291_vm3 = vsmask.f32 3328  ;;  %vm1555_vm6 = vcmask 31744  }
  0x1a   : > { %s246_s11 = scalar_select %p245_p13, %s2694_s18, 1  ;;  %vm2872_vm2 = vmor %vm518_vm0, %vm519_vm1  ;;  %vm292_vm4 = vsmask.f32 7440  ;;  %vm1580_vm7 = vcmask 64512   ;;  %vm1597_vm8 = vcmask 97280   ;;  %vm1614_vm9 = vcmask 130048  }
  0x1b   : > { %s2466_s12 = smul.u32 60, %s2821_s10  ;;  %vm2919_vm5 = vmor %vm291_vm3, %vm292_vm4  ;;  %vm1631_vm10 = vcmask 162816   ;;  %vm1736_vm11 = vcmask 1041408   ;;  %vm1648_vm12 = vcmask 195584   ;;  %vm1665_vm13 = vcmask 228352   ;;  %s2036_s27 = sadd.s32 %s2694_s18, %s2402_s26 }
  0x1c   : > { %s2465_s13 = smul.u32 30, %s246_s11  ;;  %s2716_s11 = smov 4   ;;  %vm1682_vm14 = vcmask 261120   ;;  %vm1719_vm15 = vcmask 293888   ;;  %vm1901_vm0 = vcmask 257024   ;;  %vm1955_vm1 = vcmask 253952  }
  0x1e   : > { %s249_s14 = sadd.s32 %s2466_s12, %s2465_s13  ;;  %s2717_s12 = smov 16  }
  0x1f   : > { %s2211_s23 = sshll.u32 %s249_s14, 2  ;;  %s2718_s13 = smov 28  }
  0x20   : > { %s2828_s28 = scalar_lea.vmem %s3714_s0, %s2211_s23  ;;  %s2719_s14 = smov 32  }
  0x21   : > { %v2225_v0 = vld [vmem:[%s2828_s28 + $0x18] sm:$0xf]  ;;  %v2832_v1 = vld [vmem:[%s2828_s28 + $0x1c] sm:$0xf]  ;;  %v2223_v2 = vld [vmem:[%s2828_s28 + $0xc] sm:$0xf] }
  0x22   : > { %v636_v3 = vshll.u32 %v2832_v1, 16  ;;  %v640_v4 = vshrl.u32 %v2832_v1, 16  ;;  %v2328_v5 = vcombine.low %v2225_v0, %v2832_v1  ;;  %v627_v6 = vshrl.u32 %v2225_v0, 16  ;;  %v2839_v7 = vld [vmem:[%s2828_s28 + $0x10] sm:$0xf] }
  0x23   : > { %v630_v8 = vshll.u32 %v2225_v0, 16  ;;  %v612_v9 = vshll.u32 %v2839_v7, 16  ;;  %v616_v10 = vshrl.u32 %v2839_v7, 16  ;;  %v2327_v11 = vcombine.low %v2223_v2, %v2839_v7  ;;  %v2265_v12 = vld [vmem:[%s2828_s28 + $0x24] sm:$0xf] }
  0x24   : > { %v2845_v13 = vrot.slane %v640_v4, 4  ;;  %1333 = vrot.lane.b32.xlu1 %v2328_v5, %s2712_s5  ;;  %v629_v14 = vrot.slane %v627_v6, 4  ;;  %v603_v15 = vshrl.u32 %v2223_v2, 16  ;;  %v606_v16 = vshll.u32 %v2223_v2, 16  ;;  %v2849_v17 = vld [vmem:[%s2828_s28 + $0x28] sm:$0xf] }
  0x25   : > { %v632_v18 = vrot.slane %v630_v8, 5  ;;  %v2851_v19 = vrot.slane %v616_v10, 4  ;;  %1331 = vrot.lane.b32.xlu0 %v2327_v11, %s2712_s5  ;;  %v932_v20 = vshrl.u32 %v2265_v12, 16  ;;  %v935_v21 = vshll.u32 %v2265_v12, 16  ;;  %v2263_v22 = vld [vmem:[%s2828_s28 + $0x18] sm:$0xf] }
  0x26   : > { %v605_v23 = vrot.slane %v603_v15, 4  ;;  %v608_v24 = vrot.slane %v606_v16, 5  ;;  %v945_v25 = vshrl.u32 %v2849_v17, 16  ;;  %v2352_v26 = vcombine.low %v2265_v12, %v2849_v17  ;;  %v2858_v27 = vld [vmem:[%s2828_s28 + $0x1c] sm:$0xf] }
  0x27   : > { %v633_v28 = vor.u32 %v632_v18, %v629_v14  ;;  %v2860_v29 = vrot.slane %v932_v20, 4  ;;  %v2862_v30 = vrot.slane %v935_v21, 5  ;;  %v908_v31 = vshrl.u32 %v2263_v22, 16  ;;  %v2865_v32 = vld [vmem:[%s2828_s28 + $0x14] sm:$0x1] }
  0x28   : > { %v609_v33 = vor.u32 %v608_v24, %v605_v23  ;;  %1461 = vrot.lane.b32.xlu1 %v2352_v26, %s2713_s6  ;;  %v911_v34 = vshll.u32 %v2263_v22, 16  ;;  %v921_v35 = vshrl.u32 %v2858_v27, 16  ;;  %v2351_v36 = vcombine.low %v2263_v22, %v2858_v27  ;;  %v2247_v38 = vld [vmem:[%s2828_s28 + $0xc] sm:$0xe]  ;;  %v268_v39 = vld [vmem:[%s2828_s28 + $0x4] sm:$0xf] }
  0x29   : > { %v2878_v40 = vrot.slane %v633_v28, 4  ;;  %v2880_v41 = vrot.slane %v908_v31, 4  ;;  %v2255_v42 = vrot.slane %v2247_v38, 9  ;;  %v828_v43 = vrot.slane %v2839_v7, 5  ;;  %v283_v44 = vld [vmem:[%s2828_s28 + $0x8] sm:$0x1] }
  0x2a   : > { %v2884_v45 = vrot.slane %v609_v33, 4  ;;  %v2886_v46 = vrot.slane %v911_v34, 5  ;;  %1459 = vrot.lane.b32.xlu0 %v2351_v36, %s2713_s6  ;;  %v831_v47 = vrot.slane %v2865_v32, 5  ;;  %v486_v48 = vld [vmem:[%s2828_s28] sm:$0xe]  ;;  %v523_v49 = vrot.slane %v268_v39, 5 }
  0x2b   : > { %v829_v50 = vsel %vm2872_vm2, %v2255_v42, %v828_v43  ;;  %v830_v51 = vrot.slane %v828_v43, 4  ;;  %v2215_v52 = vrot.slane %v486_v48, 9  ;;  %v526_v53 = vrot.slane %v283_v44, 5  ;;  %v270_v54 = vld [vmem:[%s2828_s28 + $0x10] sm:$0xf] }
  0x2c   : > { %v525_v55 = vrot.slane %v523_v49, 4  ;;  %v284_v56 = vld [vmem:[%s2828_s28 + $0x14] sm:$0x1]  ;;  %v487_v57 = vld [vmem:[%s2828_s28 + $0xc] sm:$0xe]  ;;  %v530_v58 = vrot.slane %v270_v54, 5  ;;  %v938_v59 = vor.u32 %v2862_v30, %v2860_v29  ;;  %v914_v60 = vor.u32 %v2886_v46, %v2880_v41 }
  0x2d   : > { %v832_v61 = vsel %vm2872_vm2, %v830_v51, %v831_v47  ;;  %v524_v62 = vsel %vm2872_vm2, %v2215_v52, %v523_v49  ;;  %v2216_v63 = vrot.slane %v487_v57, 9  ;;  %v533_v0 = vrot.slane %v284_v56, 5  ;;  %v267_v2 = vld [vmem:[%s2828_s28] sm:$0xf]  ;;  %v2248_v10 = vld [vmem:[%s2828_s28 + $0x18] sm:$0xe] }
  0x2e   : > { %v2343_v4 = vcombine.low %v829_v50, %v832_v61  ;;  %v527_v5 = vsel %vm2872_vm2, %v525_v55, %v526_v53  ;;  %v532_v6 = vrot.slane %v530_v58, 4  ;;  %v295_v8 = vshrl.u32 %v267_v2, 16  ;;  %v2240_v16 = vld [vmem:[%s2828_s28 + $0x20] sm:$0x1]  ;;  %v269_v23 = vld [vmem:[%s2828_s28 + $0xc] sm:$0xf] }
  0x2f   : > { %v2319_v11 = vcombine.low %v524_v62, %v527_v5  ;;  %v531_v12 = vsel %vm2872_vm2, %v2216_v63, %v530_v58  ;;  %v298_v14 = vshll.u32 %v267_v2, 16  ;;  %v304_v15 = vshll.u32 %v268_v39, 16  ;;  %v2279_v30 = vld [vmem:[%s2828_s28 + $0x20] sm:$0x1] }
  0x30   : > { %1411 = vrot.lane.b32.xlu0 %v2343_v4, %s2714_s7  ;;  %v534_v18 = vsel %vm2872_vm2, %v532_v6, %v533_v0  ;;  %v297_v20 = vrot.slane %v295_v8, 4  ;;  %v308_v21 = vshrl.u32 %v268_v39, 16  ;;  %v314_v22 = vshll.u32 %v283_v44, 16 }
  0x31   : > { %1283 = vrot.lane.b32.xlu1 %v2319_v11, %s2715_s8  ;;  %v2320_v24 = vcombine.low %v531_v12, %v534_v18  ;;  %v300_v26 = vrot.slane %v298_v14, 5  ;;  %v306_v28 = vrot.slane %v304_v15, 5  ;;  %v2256_v31 = vrot.slane %v2248_v10, 9 }
  0x32   : > { %v310_v33 = vrot.slane %v308_v21, 4  ;;  %v316_v34 = vrot.slane %v314_v22, 5  ;;  %v835_v36 = vrot.slane %v2832_v1, 5  ;;  %v838_v38 = vrot.slane %v2240_v16, 5  ;;  %v2946_v21 = vld [vmem:[%s2828_s28 + $0x2c] sm:$0x1] }
  0x33   : > { %v301_v42 = vor.u32 %v300_v26, %v297_v20  ;;  %v319_v43 = vshrl.u32 %v269_v23, 16  ;;  %v322_v47 = vshll.u32 %v269_v23, 16  ;;  %v328_v48 = vshll.u32 %v270_v54, 16 }
  0x34   : > { %v311_v44 = vor.u32 %v310_v33, %v306_v28  ;;  %v836_v49 = vsel %vm2872_vm2, %v2256_v31, %v835_v36  ;;  %v837_v50 = vrot.slane %v835_v36, 4  ;;  %v332_v51 = vshrl.u32 %v270_v54, 16 }
  0x35   : > { %1285 = vrot.lane.b32.xlu1 %v2320_v24, %s2715_s8  ;;  %v302_v52 = vrot.slane %v301_v42, 4  ;;  %v321_v53 = vrot.slane %v319_v43, 4  ;;  %v324_v55 = vrot.slane %v322_v47, 5  ;;  %v330_v57 = vrot.slane %v328_v48, 5 }
  0x36   : > { %v312_v58 = vrot.slane %v311_v44, 4  ;;  %v839_v61 = vsel %vm2872_vm2, %v837_v50, %v838_v38  ;;  %v334_v62 = vrot.slane %v332_v51, 4  ;;  %v338_v63 = vshll.u32 %v284_v56, 16  ;;  %v2975_v38 = vld [vmem:[%s2828_s28 + $0x1c] sm:$0xf] }
  0x37   : > { %v307_v0 = vsel %vm2919_vm5, %v302_v52, %v306_v28  ;;  %v2344_v2 = vcombine.low %v836_v49, %v839_v61  ;;  %v325_v4 = vor.u32 %v324_v55, %v321_v53  ;;  %v638_v54 = vrot.slane %v636_v3, 5  ;;  %v2981_v44 = vld [vmem:[%s2828_s28 + $0x20] sm:$0x1]  ;;  %v2287_v53 = vld [vmem:[%s2828_s28 + $0x18] sm:$0xe] }
  0x38   : > { %v317_v5 = vsel %vm2919_vm5, %v312_v58, %v316_v34  ;;  %v335_v6 = vor.u32 %v334_v62, %v330_v57  ;;  %v340_v8 = vrot.slane %v338_v63, 5  ;;  %v646_v10 = vshll.u32 %v2240_v16, 16  ;;  %v273_v62 = vld [vmem:[%s2828_s28 + $0x24] sm:$0xf] }
  0x39   : > { %v2311_v11 = vcombine.low %v307_v0, %v317_v5  ;;  %1413 = vrot.lane.b32.xlu1 %v2344_v2, %s2714_s7  ;;  %v326_v12 = vrot.slane %v325_v4, 4  ;;  %v639_v56 = vsel %vm2919_vm5, %v2878_v40, %v638_v54  ;;  %v643_v14 = vor.u32 %v2845_v13, %v638_v54 }
  0x3a   : > { %v336_v15 = vrot.slane %v335_v6, 4  ;;  %v648_v1 = vrot.slane %v646_v10, 5  ;;  %v614_v3 = vrot.slane %v612_v9, 5  ;;  %v622_v18 = vshll.u32 %v2865_v32, 16 }
  0x3b   : > { %1243 = vrot.lane.b32.xlu0 %v2311_v11, %s2716_s11  ;;  %v331_v16 = vsel %vm2919_vm5, %v326_v12, %v330_v57  ;;  %v644_v20 = vrot.slane %v643_v14, 4  ;;  %v939_v13 = vrot.slane %v938_v59, 4  ;;  %v941_v7 = vshll.u32 %v2849_v17, 16  ;;  %v271_v59 = vld [vmem:[%s2828_s28 + $0x18] sm:$0xf] }
  0x3c   : > { %v341_v9 = vsel %vm2919_vm5, %v336_v15, %v340_v8  ;;  %v615_v32 = vsel %vm2919_vm5, %v2884_v45, %v614_v3  ;;  %v619_v40 = vor.u32 %v2851_v19, %v614_v3  ;;  %v624_v22 = vrot.slane %v622_v18, 5 }
  0x3d   : > { %v2312_v23 = vcombine.low %v331_v16, %v341_v9  ;;  %v649_v24 = vsel %vm2919_vm5, %v644_v20, %v648_v1  ;;  %v943_v26 = vrot.slane %v941_v7, 5  ;;  %v947_v29 = vrot.slane %v945_v25, 4  ;;  %v286_v16 = vld [vmem:[%s2828_s28 + $0x2c] sm:$0x1]  ;;  %v2288_v9 = vld [vmem:[%s2828_s28 + $0x24] sm:$0xe] }
  0x3e   : > { %v2336_v28 = vcombine.low %v639_v56, %v649_v24  ;;  %v620_v31 = vrot.slane %v619_v40, 4  ;;  %v951_v33 = vshll.u32 %v2946_v21, 16  ;;  %v915_v19 = vrot.slane %v914_v60, 4  ;;  %v274_v56 = vld [vmem:[%s2828_s28 + $0x28] sm:$0xf] }
  0x3f   : > { %1245 = vrot.lane.b32.xlu0 %v2312_v23, %s2716_s11  ;;  %v944_v45 = vsel %vm2919_vm5, %v939_v13, %v943_v26  ;;  %v948_v34 = vor.u32 %v947_v29, %v943_v26  ;;  %v917_v36 = vshll.u32 %v2858_v27, 16  ;;  %v923_v25 = vrot.slane %v921_v35, 4 }
  0x40   : > { %1373 = vrot.lane.b32.xlu1 %v2336_v28, %s2717_s12  ;;  %v625_v41 = vsel %vm2919_vm5, %v620_v31, %v624_v22  ;;  %v953_v46 = vrot.slane %v951_v33, 5  ;;  %v927_v60 = vshll.u32 %v2279_v30, 16  ;;  %v343_v42 = vshrl.u32 %v271_v59, 16 }
  0x41   : > { %v2335_v43 = vcombine.low %v615_v32, %v625_v41  ;;  %v949_v47 = vrot.slane %v948_v34, 4  ;;  %v919_v48 = vrot.slane %v917_v36, 5  ;;  %v346_v49 = vshll.u32 %v271_v59, 16  ;;  %v489_v59 = vld [vmem:[%s2828_s28 + $0x24] sm:$0xe] }
  0x42   : > { %v929_v35 = vrot.slane %v927_v60, 5  ;;  %v345_v50 = vrot.slane %v343_v42, 4  ;;  %v352_v51 = vshll.u32 %v2975_v38, 16  ;;  %v356_v52 = vshrl.u32 %v2975_v38, 16 }
  0x43   : > { %1371 = vrot.lane.b32.xlu0 %v2335_v43, %s2717_s12  ;;  %v954_v55 = vsel %vm2919_vm5, %v949_v47, %v953_v46  ;;  %v920_v57 = vsel %vm2919_vm5, %v915_v19, %v919_v48  ;;  %v924_v58 = vor.u32 %v923_v25, %v919_v48  ;;  %v348_v61 = vrot.slane %v346_v49, 5  ;;  %v3015_v47 = vld [vmem:[%s2828_s28 + $0x30] sm:$0xf] }
  0x44   : > { %v2360_v63 = vcombine.low %v944_v45, %v954_v55  ;;  %v354_v0 = vrot.slane %v352_v51, 5  ;;  %v358_v2 = vrot.slane %v356_v52, 4  ;;  %v362_v4 = vshll.u32 %v2981_v44, 16  ;;  %v488_v45 = vld [vmem:[%s2828_s28 + $0x18] sm:$0xe] }
  0x45   : > { %v925_v54 = vrot.slane %v924_v58, 4  ;;  %v349_v5 = vor.u32 %v348_v61, %v345_v50  ;;  %v2295_v6 = vrot.slane %v2287_v53, 9  ;;  %v1133_v8 = vrot.slane %v2858_v27, 5  ;;  %v2230_v58 = vld [vmem:[%s2828_s28 + $0x34] sm:$0xf] }
  0x46   : > { %1501 = vrot.lane.b32.xlu1 %v2360_v63, %s2718_s13  ;;  %v359_v10 = vor.u32 %v358_v2, %v354_v0  ;;  %v364_v11 = vrot.slane %v362_v4, 5  ;;  %v1136_v12 = vrot.slane %v2279_v30, 5  ;;  %v367_v14 = vshrl.u32 %v273_v62, 16  ;;  %v3038_v4 = vld [vmem:[%s2828_s28 + $0x28] sm:$0xf] }
  0x47   : > { %v930_v15 = vsel %vm2919_vm5, %v925_v54, %v929_v35  ;;  %v350_v1 = vrot.slane %v349_v5, 4  ;;  %v1134_v3 = vsel %vm2872_vm2, %v2295_v6, %v1133_v8  ;;  %v1135_v18 = vrot.slane %v1133_v8, 4 }
  0x48   : > { %v2359_v27 = vcombine.low %v920_v57, %v930_v15  ;;  %v360_v20 = vrot.slane %v359_v10, 4  ;;  %v369_v13 = vrot.slane %v367_v14, 4  ;;  %v370_v7 = vshll.u32 %v273_v62, 16  ;;  %v2227_v62 = vld [vmem:[%s2828_s28 + $0x24] sm:$0xf] }
  0x49   : > { %v355_v32 = vsel %vm2919_vm5, %v350_v1, %v354_v0  ;;  %v1137_v40 = vsel %vm2872_vm2, %v1135_v18, %v1136_v12  ;;  %v376_v22 = vshll.u32 %v274_v56, 16  ;;  %v380_v23 = vshrl.u32 %v274_v56, 16  ;;  %v3050_v18 = vld [vmem:[%s2828_s28 + $0x2c] sm:$0x1] }
  0x4a   : > { %1499 = vrot.lane.b32.xlu0 %v2359_v27, %s2718_s13  ;;  %v365_v24 = vsel %vm2919_vm5, %v360_v20, %v364_v11  ;;  %v2367_v26 = vcombine.low %v1134_v3, %v1137_v40  ;;  %v372_v29 = vrot.slane %v370_v7, 5  ;;  %v386_v30 = vshll.u32 %v286_v16, 16  ;;  %v2250_v7 = vld [vmem:[%s2828_s28 + $0x30] sm:$0xe] }
  0x4b   : > { %v2313_v28 = vcombine.low %v355_v32, %v365_v24  ;;  %v378_v31 = vrot.slane %v376_v22, 5  ;;  %v382_v33 = vrot.slane %v380_v23, 4  ;;  %v2296_v19 = vrot.slane %v2288_v9, 9 }
  0x4c   : > { %v373_v34 = vor.u32 %v372_v29, %v369_v13  ;;  %v388_v36 = vrot.slane %v386_v30, 5  ;;  %v1140_v25 = vrot.slane %v2849_v17, 5  ;;  %v1143_v41 = vrot.slane %v2946_v21, 5  ;;  %v2249_v30 = vld [vmem:[%s2828_s28 + $0x24] sm:$0xe] }
  0x4d   : > { %1247 = vrot.lane.b32.xlu1 %v2313_v28, %s2716_s11  ;;  %v383_v46 = vor.u32 %v382_v33, %v378_v31  ;;  %v2218_v60 = vrot.slane %v489_v59, 9  ;;  %v544_v42 = vrot.slane %v274_v56, 5  ;;  %v547_v43 = vrot.slane %v286_v16, 5  ;;  %v2242_v56 = vld [vmem:[%s2828_s28 + $0x38] sm:$0x1] }
  0x4e   : > { %1539 = vrot.lane.b32.xlu0 %v2367_v26, %s2719_s14  ;;  %v374_v48 = vrot.slane %v373_v34, 4  ;;  %v1141_v49 = vsel %vm2872_vm2, %v2296_v19, %v1140_v25  ;;  %v1142_v17 = vrot.slane %v1140_v25, 4  ;;  %v2217_v21 = vrot.slane %v488_v45, 9 }
  0x4f   : > { %v384_v35 = vrot.slane %v383_v46, 4  ;;  %v545_v50 = vsel %vm2872_vm2, %v2218_v60, %v544_v42  ;;  %v546_v51 = vrot.slane %v544_v42, 4  ;;  %v537_v52 = vrot.slane %v2975_v38, 5  ;;  %v3059_v42 = vld [vmem:[%s2828_s28 + $0x3c] sm:$0xf] }
  0x50   : > { %v379_v53 = vsel %vm2919_vm5, %v374_v48, %v378_v31  ;;  %v1144_v55 = vsel %vm2872_vm2, %v1142_v17, %v1143_v41  ;;  %v540_v57 = vrot.slane %v2981_v44, 5  ;;  %v675_v61 = vshrl.u32 %v3015_v47, 16 }
  0x51   : > { %v389_v63 = vsel %vm2919_vm5, %v384_v35, %v388_v36  ;;  %v2368_v0 = vcombine.low %v1141_v49, %v1144_v55  ;;  %v548_v38 = vsel %vm2872_vm2, %v546_v51, %v547_v43  ;;  %v538_v2 = vsel %vm2872_vm2, %v2217_v21, %v537_v52 }
  0x52   : > { %v2314_v54 = vcombine.low %v379_v53, %v389_v63  ;;  %v2322_v44 = vcombine.low %v545_v50, %v548_v38  ;;  %v539_v5 = vrot.slane %v537_v52, 4  ;;  %v677_v6 = vrot.slane %v675_v61, 4  ;;  %v3076_v53 = vld [vmem:[%s2828_s28 + $0x40] sm:$0xf]  ;;  %v3086_v38 = vld [vmem:[%s2828_s28 + $0x34] sm:$0xf] }
  0x53   : > { %1541 = vrot.lane.b32.xlu0 %v2368_v0, %s2719_s14  ;;  %v678_v8 = vshll.u32 %v3015_v47, 16  ;;  %v688_v10 = vshrl.u32 %v2230_v58, 16  ;;  %v2330_v11 = vcombine.low %v3015_v47, %v2230_v58  ;;  %v651_v12 = vshrl.u32 %v2227_v62, 16 }
  0x54   : > { %1249 = vrot.lane.b32.xlu1 %v2314_v54, %s2716_s11  ;;  %v541_v14 = vsel %vm2872_vm2, %v539_v5, %v540_v57  ;;  %v654_v15 = vshll.u32 %v2227_v62, 16  ;;  %v664_v1 = vshrl.u32 %v3038_v4, 16  ;;  %v2329_v3 = vcombine.low %v2227_v62, %v3038_v4 }
  0x55   : > { %v2321_v16 = vcombine.low %v538_v2, %v541_v14  ;;  %v680_v27 = vrot.slane %v678_v8, 5  ;;  %v653_v20 = vrot.slane %v651_v12, 4  ;;  %v684_v13 = vshll.u32 %v2230_v58, 16 }
  0x56   : > { %v656_v9 = vrot.slane %v654_v15, 5  ;;  %v690_v32 = vrot.slane %v688_v10, 4  ;;  %v694_v40 = vshll.u32 %v2242_v56, 16  ;;  %v660_v22 = vshll.u32 %v3038_v4, 16 }
  0x57   : > { %1287 = vrot.lane.b32.xlu0 %v2321_v16, %s2715_s8  ;;  %v681_v23 = vor.u32 %v680_v27, %v677_v6  ;;  %v686_v24 = vrot.slane %v684_v13, 5  ;;  %v666_v26 = vrot.slane %v664_v1, 4  ;;  %v670_v29 = vshll.u32 %v3050_v18, 16  ;;  %v3101_v1 = vld [vmem:[%s2828_s28 + $0x38] sm:$0x1] }
  0x58   : > { %1289 = vrot.lane.b32.xlu1 %v2322_v44, %s2715_s8  ;;  %v696_v59 = vrot.slane %v694_v40, 5  ;;  %v657_v28 = vor.u32 %v656_v9, %v653_v20  ;;  %v662_v31 = vrot.slane %v660_v22, 5  ;;  %v2258_v33 = vrot.slane %v2250_v7, 9  ;;  %v275_v20 = vld [vmem:[%s2828_s28 + $0x30] sm:$0xf] }
  0x59   : > { %v682_v19 = vrot.slane %v681_v23, 4  ;;  %v691_v45 = vor.u32 %v690_v32, %v686_v24  ;;  %v672_v34 = vrot.slane %v670_v29, 5  ;;  %v849_v36 = vrot.slane %v2230_v58, 5  ;;  %v2267_v58 = vld [vmem:[%s2828_s28 + $0x30] sm:$0xf] }
  0x5a   : > { %v658_v25 = vrot.slane %v657_v28, 4  ;;  %v667_v41 = vor.u32 %v666_v26, %v662_v31  ;;  %v852_v46 = vrot.slane %v2242_v56, 5  ;;  %v2257_v60 = vrot.slane %v2249_v30, 9  ;;  %v3110_v26 = vld [vmem:[%s2828_s28 + $0x34] sm:$0xf] }
  0x5b   : > { %1335 = vrot.lane.b32.xlu0 %v2329_v3, %s2712_s5  ;;  %v687_v43 = vsel %vm2919_vm5, %v682_v19, %v686_v24  ;;  %v692_v47 = vrot.slane %v691_v45, 4  ;;  %v850_v48 = vsel %vm2872_vm2, %v2258_v33, %v849_v36  ;;  %v851_v49 = vrot.slane %v849_v36, 4  ;;  %v2289_v36 = vld [vmem:[%s2828_s28 + $0x30] sm:$0xe] }
  0x5c   : > { %1337 = vrot.lane.b32.xlu1 %v2330_v11, %s2712_s5  ;;  %v663_v17 = vsel %vm2919_vm5, %v658_v25, %v662_v31  ;;  %v668_v21 = vrot.slane %v667_v41, 4  ;;  %v842_v35 = vrot.slane %v3038_v4, 5  ;;  %v845_v50 = vrot.slane %v3050_v18, 5  ;;  %v3093_v11 = vld [vmem:[%s2828_s28 + $0x44] sm:$0x1] }
  0x5d   : > { %v697_v51 = vsel %vm2919_vm5, %v692_v47, %v696_v59  ;;  %v853_v52 = vsel %vm2872_vm2, %v851_v49, %v852_v46  ;;  %v980_v55 = vshrl.u32 %v3059_v42, 16  ;;  %v983_v57 = vshll.u32 %v3059_v42, 16  ;;  %v3114_v59 = vld [vmem:[%s2828_s28 + $0x38] sm:$0x1] }
  0x5e   : > { %v2338_v61 = vcombine.low %v687_v43, %v697_v51  ;;  %v673_v62 = vsel %vm2919_vm5, %v668_v21, %v672_v34  ;;  %v2346_v63 = vcombine.low %v850_v48, %v853_v52  ;;  %v843_v0 = vsel %vm2872_vm2, %v2257_v60, %v842_v35 }
  0x5f   : > { %v2337_v2 = vcombine.low %v663_v17, %v673_v62  ;;  %v844_v4 = vrot.slane %v842_v35, 4  ;;  %v982_v54 = vrot.slane %v980_v55, 4  ;;  %v985_v44 = vrot.slane %v983_v57, 5 }
  0x60   : > { %1377 = vrot.lane.b32.xlu1 %v2338_v61, %s2717_s12  ;;  %v993_v5 = vshrl.u32 %v3076_v53, 16  ;;  %v2354_v6 = vcombine.low %v3059_v42, %v3076_v53  ;;  %v956_v8 = vshrl.u32 %v2267_v58, 16  ;;  %v959_v10 = vshll.u32 %v2267_v58, 16 }
  0x61   : > { %1375 = vrot.lane.b32.xlu0 %v2337_v2, %s2717_s12  ;;  %v846_v12 = vsel %vm2872_vm2, %v844_v4, %v845_v50  ;;  %v969_v56 = vshrl.u32 %v3086_v38, 16  ;;  %v2353_v14 = vcombine.low %v2267_v58, %v3086_v38  ;;  %v986_v15 = vor.u32 %v985_v44, %v982_v54  ;;  %v3127_v50 = vld [vmem:[%s2828_s28 + $0x3c] sm:$0xf]  ;;  %v3133_v58 = vld [vmem:[%s2828_s28 + $0x40] sm:$0xf] }
  0x62   : > { %v2345_v3 = vcombine.low %v843_v0, %v846_v12  ;;  %v958_v18 = vrot.slane %v956_v8, 4  ;;  %v961_v16 = vrot.slane %v959_v10, 5  ;;  %v989_v27 = vshll.u32 %v3076_v53, 16  ;;  %v288_v2 = vld [vmem:[%s2828_s28 + $0x44] sm:$0x1] }
  0x63   : > { %v987_v13 = vrot.slane %v986_v15, 4  ;;  %v995_v7 = vrot.slane %v993_v5, 4  ;;  %v999_v9 = vshll.u32 %v3093_v11, 16  ;;  %v965_v32 = vshll.u32 %v3086_v38, 16  ;;  %v2290_v12 = vld [vmem:[%s2828_s28 + $0x3c] sm:$0xe] }
  0x64   : > { %1417 = vrot.lane.b32.xlu1 %v2346_v63, %s2714_s7  ;;  %v991_v40 = vrot.slane %v989_v27, 5  ;;  %v962_v22 = vor.u32 %v961_v16, %v958_v18  ;;  %v971_v23 = vrot.slane %v969_v56, 4  ;;  %v975_v24 = vshll.u32 %v3101_v1, 16 }
  0x65   : > { %1415 = vrot.lane.b32.xlu0 %v2345_v3, %s2714_s7  ;;  %v1001_v29 = vrot.slane %v999_v9, 5  ;;  %v967_v30 = vrot.slane %v965_v32, 5  ;;  %v391_v28 = vshrl.u32 %v275_v20, 16  ;;  %v394_v31 = vshll.u32 %v275_v20, 16  ;;  %v491_v20 = vld [vmem:[%s2828_s28 + $0x3c] sm:$0xe] }
  0x66   : > { %v992_v33 = vsel %vm2919_vm5, %v987_v13, %v991_v40  ;;  %v996_v19 = vor.u32 %v995_v7, %v991_v40  ;;  %v963_v45 = vrot.slane %v962_v22, 4  ;;  %v977_v34 = vrot.slane %v975_v24, 5  ;;  %v490_v40 = vld [vmem:[%s2828_s28 + $0x30] sm:$0xe] }
  0x67   : > { %v972_v25 = vor.u32 %v971_v23, %v967_v30  ;;  %v393_v41 = vrot.slane %v391_v28, 4  ;;  %v396_v46 = vrot.slane %v394_v31, 5  ;;  %v400_v60 = vshll.u32 %v3110_v26, 16 }
  0x68   : > { %1465 = vrot.lane.b32.xlu1 %v2354_v6, %s2713_s6  ;;  %v997_v42 = vrot.slane %v996_v19, 4  ;;  %v968_v43 = vsel %vm2919_vm5, %v963_v45, %v967_v30  ;;  %v404_v47 = vshrl.u32 %v3110_v26, 16  ;;  %v410_v48 = vshll.u32 %v3114_v59, 16  ;;  %v3161_v19 = vld [vmem:[%s2828_s28 + $0x48] sm:$0xf] }
  0x69   : > { %1463 = vrot.lane.b32.xlu0 %v2353_v14, %s2713_s6  ;;  %v973_v49 = vrot.slane %v972_v25, 4  ;;  %v397_v17 = vor.u32 %v396_v46, %v393_v41  ;;  %v402_v21 = vrot.slane %v400_v60, 5  ;;  %v2297_v35 = vrot.slane %v2289_v36, 9 }
  0x6a   : > { %v1002_v51 = vsel %vm2919_vm5, %v997_v42, %v1001_v29  ;;  %v406_v52 = vrot.slane %v404_v47, 4  ;;  %v412_v55 = vrot.slane %v410_v48, 5  ;;  %v1147_v57 = vrot.slane %v3086_v38, 5  ;;  %v2234_v47 = vld [vmem:[%s2828_s28 + $0x4c] sm:$0xf] }
  0x6b   : > { %v2362_v61 = vcombine.low %v992_v33, %v1002_v51  ;;  %v978_v62 = vsel %vm2919_vm5, %v973_v49, %v977_v34  ;;  %v398_v63 = vrot.slane %v397_v17, 4  ;;  %v1150_v0 = vrot.slane %v3101_v1, 5  ;;  %v2231_v49 = vld [vmem:[%s2828_s28 + $0x3c] sm:$0xf]  ;;  %v3184_v51 = vld [vmem:[%s2828_s28 + $0x40] sm:$0xf] }
  0x6c   : > { %v2361_v4 = vcombine.low %v968_v43, %v978_v62  ;;  %v407_v54 = vor.u32 %v406_v52, %v402_v21  ;;  %v1148_v44 = vsel %vm2872_vm2, %v2297_v35, %v1147_v57  ;;  %v1149_v5 = vrot.slane %v1147_v57, 4 }
  0x6d   : > { %1505 = vrot.lane.b32.xlu1 %v2362_v61, %s2718_s13  ;;  %v403_v38 = vsel %vm2919_vm5, %v398_v63, %v402_v21  ;;  %v415_v6 = vshrl.u32 %v3127_v50, 16  ;;  %v418_v8 = vshll.u32 %v3127_v50, 16  ;;  %v424_v10 = vshll.u32 %v3133_v58, 16 }
  0x6e   : > { %1503 = vrot.lane.b32.xlu0 %v2361_v4, %s2718_s13  ;;  %v408_v56 = vrot.slane %v407_v54, 4  ;;  %v1151_v14 = vsel %vm2872_vm2, %v1149_v5, %v1150_v0  ;;  %v428_v15 = vshrl.u32 %v3133_v58, 16  ;;  %v434_v1 = vshll.u32 %v288_v2, 16 }
  0x6f   : > { %v2369_v3 = vcombine.low %v1148_v44, %v1151_v14  ;;  %v417_v18 = vrot.slane %v415_v6, 4  ;;  %v420_v16 = vrot.slane %v418_v8, 5  ;;  %v426_v27 = vrot.slane %v424_v10, 5 }
  0x70   : > { %v413_v13 = vsel %vm2919_vm5, %v408_v56, %v412_v55  ;;  %v430_v7 = vrot.slane %v428_v15, 4  ;;  %v436_v9 = vrot.slane %v434_v1, 5  ;;  %v2298_v32 = vrot.slane %v2290_v12, 9  ;;  %v2252_v56 = vld [vmem:[%s2828_s28 + $0x48] sm:$0xe] }
  0x71   : > { %v2315_v22 = vcombine.low %v403_v38, %v413_v13  ;;  %v421_v23 = vor.u32 %v420_v16, %v417_v18  ;;  %v1154_v24 = vrot.slane %v3076_v53, 5  ;;  %v1157_v29 = vrot.slane %v3093_v11, 5  ;;  %v3196_v38 = vld [vmem:[%s2828_s28 + $0x44] sm:$0x1]  ;;  %v2251_v13 = vld [vmem:[%s2828_s28 + $0x3c] sm:$0xe] }
  0x72   : > { %1543 = vrot.lane.b32.xlu0 %v2369_v3, %s2719_s14  ;;  %v431_v30 = vor.u32 %v430_v7, %v426_v27  ;;  %v2220_v28 = vrot.slane %v491_v20, 9  ;;  %v558_v31 = vrot.slane %v3133_v58, 5  ;;  %v561_v33 = vrot.slane %v288_v2, 5  ;;  %v2244_v2 = vld [vmem:[%s2828_s28 + $0x50] sm:$0x1] }
  0x73   : > { %1251 = vrot.lane.b32.xlu1 %v2315_v22, %s2716_s11  ;;  %v422_v45 = vrot.slane %v421_v23, 4  ;;  %v1155_v34 = vsel %vm2872_vm2, %v2298_v32, %v1154_v24  ;;  %v1156_v53 = vrot.slane %v1154_v24, 4  ;;  %v2219_v11 = vrot.slane %v490_v40, 9 }
  0x74   : > { %v432_v36 = vrot.slane %v431_v30, 4  ;;  %v559_v25 = vsel %vm2872_vm2, %v2220_v28, %v558_v31  ;;  %v560_v41 = vrot.slane %v558_v31, 4  ;;  %v551_v46 = vrot.slane %v3110_v26, 5 }
  0x75   : > { %v427_v60 = vsel %vm2919_vm5, %v422_v45, %v426_v27  ;;  %v1158_v42 = vsel %vm2872_vm2, %v1156_v53, %v1157_v29  ;;  %v554_v43 = vrot.slane %v3114_v59, 5  ;;  %v723_v48 = vshrl.u32 %v3161_v19, 16 }
  0x76   : > { %v437_v17 = vsel %vm2919_vm5, %v432_v36, %v436_v9  ;;  %v2370_v21 = vcombine.low %v1155_v34, %v1158_v42  ;;  %v562_v26 = vsel %vm2872_vm2, %v560_v41, %v561_v33  ;;  %v552_v35 = vsel %vm2872_vm2, %v2219_v11, %v551_v46 }
  0x77   : > { %v2316_v52 = vcombine.low %v427_v60, %v437_v17  ;;  %v2324_v59 = vcombine.low %v559_v25, %v562_v26  ;;  %v553_v55 = vrot.slane %v551_v46, 4  ;;  %v725_v57 = vrot.slane %v723_v48, 4 }
  0x78   : > { %1545 = vrot.lane.b32.xlu0 %v2370_v21, %s2719_s14  ;;  %v726_v61 = vshll.u32 %v3161_v19, 16  ;;  %v736_v62 = vshrl.u32 %v2234_v47, 16  ;;  %v2332_v63 = vcombine.low %v3161_v19, %v2234_v47  ;;  %v699_v0 = vshrl.u32 %v2231_v49, 16  ;;  %v3205_v19 = vld [vmem:[%s2828_s28 + $0x54] sm:$0xf] }
  0x79   : > { %1253 = vrot.lane.b32.xlu1 %v2316_v52, %s2716_s11  ;;  %v555_v4 = vsel %vm2872_vm2, %v553_v55, %v554_v43  ;;  %v702_v54 = vshll.u32 %v2231_v49, 16  ;;  %v712_v44 = vshrl.u32 %v3184_v51, 16  ;;  %v2331_v5 = vcombine.low %v2231_v49, %v3184_v51  ;;  %v3222_v43 = vld [vmem:[%s2828_s28 + $0x58] sm:$0xf]  ;;  %v2271_v49 = vld [vmem:[%s2828_s28 + $0x48] sm:$0xf] }
  0x7a   : > { %v2323_v6 = vcombine.low %v552_v35, %v555_v4  ;;  %v728_v8 = vrot.slane %v726_v61, 5  ;;  %v701_v10 = vrot.slane %v699_v0, 4  ;;  %v732_v12 = vshll.u32 %v2234_v47, 16 }
  0x7b   : > { %v704_v14 = vrot.slane %v702_v54, 5  ;;  %v738_v15 = vrot.slane %v736_v62, 4  ;;  %v742_v1 = vshll.u32 %v2244_v2, 16  ;;  %v708_v3 = vshll.u32 %v3184_v51, 16 }
  0x7c   : > { %1291 = vrot.lane.b32.xlu0 %v2323_v6, %s2715_s8  ;;  %v729_v18 = vor.u32 %v728_v8, %v725_v57  ;;  %v734_v16 = vrot.slane %v732_v12, 5  ;;  %v714_v27 = vrot.slane %v712_v44, 4  ;;  %v718_v20 = vshll.u32 %v3196_v38, 16 }
  0x7d   : > { %1293 = vrot.lane.b32.xlu1 %v2324_v59, %s2715_s8  ;;  %v744_v7 = vrot.slane %v742_v1, 5  ;;  %v705_v9 = vor.u32 %v704_v14, %v701_v10  ;;  %v710_v32 = vrot.slane %v708_v3, 5  ;;  %v2260_v40 = vrot.slane %v2252_v56, 9  ;;  %v3251_v56 = vld [vmem:[%s2828_s28 + $0x48] sm:$0xf] }
  0x7e   : > { %v730_v22 = vrot.slane %v729_v18, 4  ;;  %v739_v23 = vor.u32 %v738_v15, %v734_v16  ;;  %v720_v24 = vrot.slane %v718_v20, 5  ;;  %v863_v29 = vrot.slane %v2234_v47, 5 }
  0x7f   : > { %v706_v30 = vrot.slane %v705_v9, 4  ;;  %v715_v28 = vor.u32 %v714_v27, %v710_v32  ;;  %v866_v31 = vrot.slane %v2244_v2, 5  ;;  %v2259_v33 = vrot.slane %v2251_v13, 9  ;;  %v3239_v2 = vld [vmem:[%s2828_s28 + $0x5c] sm:$0x1] }
  0x80   : > { %1339 = vrot.lane.b32.xlu0 %v2331_v5, %s2712_s5  ;;  %v735_v45 = vsel %vm2919_vm5, %v730_v22, %v734_v16  ;;  %v740_v34 = vrot.slane %v739_v23, 4  ;;  %v864_v53 = vsel %vm2872_vm2, %v2260_v40, %v863_v29  ;;  %v865_v11 = vrot.slane %v863_v29, 4  ;;  %v3258_v13 = vld [vmem:[%s2828_s28 + $0x4c] sm:$0xf] }
  0x81   : > { %1341 = vrot.lane.b32.xlu1 %v2332_v63, %s2712_s5  ;;  %v711_v36 = vsel %vm2919_vm5, %v706_v30, %v710_v32  ;;  %v716_v25 = vrot.slane %v715_v28, 4  ;;  %v856_v41 = vrot.slane %v3184_v51, 5  ;;  %v859_v46 = vrot.slane %v3196_v38, 5  ;;  %v3232_v51 = vld [vmem:[%s2828_s28 + $0x4c] sm:$0xf] }
  0x82   : > { %v745_v60 = vsel %vm2919_vm5, %v740_v34, %v744_v7  ;;  %v867_v42 = vsel %vm2872_vm2, %v865_v11, %v866_v31  ;;  %v1028_v47 = vshrl.u32 %v3205_v19, 16  ;;  %v1031_v48 = vshll.u32 %v3205_v19, 16  ;;  %v3247_v38 = vld [vmem:[%s2828_s28 + $0x50] sm:$0x1]  ;;  %v2291_v28 = vld [vmem:[%s2828_s28 + $0x48] sm:$0xe] }
  0x83   : > { %v2340_v17 = vcombine.low %v735_v45, %v745_v60  ;;  %v721_v21 = vsel %vm2919_vm5, %v716_v25, %v720_v24  ;;  %v2348_v26 = vcombine.low %v864_v53, %v867_v42  ;;  %v857_v35 = vsel %vm2872_vm2, %v2259_v33, %v856_v41  ;;  %v3262_v32 = vld [vmem:[%s2828_s28 + $0x50] sm:$0x1]  ;;  %v3277_v42 = vld [vmem:[%s2828_s28 + $0x54] sm:$0xf] }
  0x84   : > { %v2339_v52 = vcombine.low %v711_v36, %v721_v21  ;;  %v858_v59 = vrot.slane %v856_v41, 4  ;;  %v1030_v55 = vrot.slane %v1028_v47, 4  ;;  %v1033_v57 = vrot.slane %v1031_v48, 5  ;;  %v3283_v21 = vld [vmem:[%s2828_s28 + $0x58] sm:$0xf] }
  0x85   : > { %1381 = vrot.lane.b32.xlu1 %v2340_v17, %s2717_s12  ;;  %v1041_v61 = vshrl.u32 %v3222_v43, 16  ;;  %v2356_v62 = vcombine.low %v3205_v19, %v3222_v43  ;;  %v1004_v63 = vshrl.u32 %v2271_v49, 16  ;;  %v1007_v0 = vshll.u32 %v2271_v49, 16 }
  0x86   : > { %1379 = vrot.lane.b32.xlu0 %v2339_v52, %s2717_s12  ;;  %v860_v4 = vsel %vm2872_vm2, %v858_v59, %v859_v46  ;;  %v1017_v54 = vshrl.u32 %v3232_v51, 16  ;;  %v2355_v44 = vcombine.low %v2271_v49, %v3232_v51  ;;  %v1034_v5 = vor.u32 %v1033_v57, %v1030_v55  ;;  %v290_v55 = vld [vmem:[%s2828_s28 + $0x5c] sm:$0x1] }
  0x87   : > { %v2347_v6 = vcombine.low %v857_v35, %v860_v4  ;;  %v1006_v8 = vrot.slane %v1004_v63, 4  ;;  %v1009_v10 = vrot.slane %v1007_v0, 5  ;;  %v1037_v12 = vshll.u32 %v3222_v43, 16 }
  0x88   : > { %v1035_v14 = vrot.slane %v1034_v5, 4  ;;  %v1043_v15 = vrot.slane %v1041_v61, 4  ;;  %v1047_v1 = vshll.u32 %v3239_v2, 16  ;;  %v1013_v3 = vshll.u32 %v3232_v51, 16 }
  0x89   : > { %1421 = vrot.lane.b32.xlu1 %v2348_v26, %s2714_s7  ;;  %v1039_v18 = vrot.slane %v1037_v12, 5  ;;  %v1010_v16 = vor.u32 %v1009_v10, %v1006_v8  ;;  %v1019_v27 = vrot.slane %v1017_v54, 4  ;;  %v1023_v20 = vshll.u32 %v3247_v38, 16 }
  0x8a   : > { %1419 = vrot.lane.b32.xlu0 %v2347_v6, %s2714_s7  ;;  %v1049_v7 = vrot.slane %v1047_v1, 5  ;;  %v1015_v9 = vrot.slane %v1013_v3, 5  ;;  %v439_v40 = vshrl.u32 %v3251_v56, 16  ;;  %v442_v22 = vshll.u32 %v3251_v56, 16  ;;  %v493_v1 = vld [vmem:[%s2828_s28 + $0x54] sm:$0xe] }
  0x8b   : > { %v1040_v23 = vsel %vm2919_vm5, %v1035_v14, %v1039_v18  ;;  %v1044_v24 = vor.u32 %v1043_v15, %v1039_v18  ;;  %v1011_v29 = vrot.slane %v1010_v16, 4  ;;  %v1025_v30 = vrot.slane %v1023_v20, 5  ;;  %v492_v20 = vld [vmem:[%s2828_s28 + $0x48] sm:$0xe] }
  0x8c   : > { %v1020_v31 = vor.u32 %v1019_v27, %v1015_v9  ;;  %v441_v33 = vrot.slane %v439_v40, 4  ;;  %v444_v19 = vrot.slane %v442_v22, 5  ;;  %v448_v45 = vshll.u32 %v3258_v13, 16 }
  0x8d   : > { %1469 = vrot.lane.b32.xlu1 %v2356_v62, %s2713_s6  ;;  %v1045_v34 = vrot.slane %v1044_v24, 4  ;;  %v1016_v53 = vsel %vm2919_vm5, %v1011_v29, %v1015_v9  ;;  %v452_v11 = vshrl.u32 %v3258_v13, 16  ;;  %v458_v36 = vshll.u32 %v3262_v32, 16 }
  0x8e   : > { %1467 = vrot.lane.b32.xlu0 %v2355_v44, %s2713_s6  ;;  %v1021_v25 = vrot.slane %v1020_v31, 4  ;;  %v445_v41 = vor.u32 %v444_v19, %v441_v33  ;;  %v450_v46 = vrot.slane %v448_v45, 5  ;;  %v2299_v60 = vrot.slane %v2291_v28, 9  ;;  %v2292_v44 = vld [vmem:[%s2828_s28 + $0x54] sm:$0xe] }
  0x8f   : > { %v1050_v47 = vsel %vm2919_vm5, %v1045_v34, %v1049_v7  ;;  %v454_v48 = vrot.slane %v452_v11, 4  ;;  %v460_v49 = vrot.slane %v458_v36, 5  ;;  %v1161_v17 = vrot.slane %v3232_v51, 5  ;;  %v3311_v28 = vld [vmem:[%s2828_s28 + $0x60] sm:$0xf] }
  0x90   : > { %v2364_v26 = vcombine.low %v1040_v23, %v1050_v47  ;;  %v1026_v35 = vsel %vm2919_vm5, %v1021_v25, %v1025_v30  ;;  %v446_v52 = vrot.slane %v445_v41, 4  ;;  %v1164_v59 = vrot.slane %v3247_v38, 5  ;;  %v2235_v47 = vld [vmem:[%s2828_s28 + $0x54] sm:$0xf] }
  0x91   : > { %v2363_v57 = vcombine.low %v1016_v53, %v1026_v35  ;;  %v455_v61 = vor.u32 %v454_v48, %v450_v46  ;;  %v1162_v62 = vsel %vm2872_vm2, %v2299_v60, %v1161_v17  ;;  %v1163_v63 = vrot.slane %v1161_v17, 4  ;;  %v3336_v35 = vld [vmem:[%s2828_s28 + $0x58] sm:$0xf] }
  0x92   : > { %1509 = vrot.lane.b32.xlu1 %v2364_v26, %s2718_s13  ;;  %v451_v51 = vsel %vm2919_vm5, %v446_v52, %v450_v46  ;;  %v463_v0 = vshrl.u32 %v3277_v42, 16  ;;  %v466_v4 = vshll.u32 %v3277_v42, 16  ;;  %v472_v54 = vshll.u32 %v3283_v21, 16  ;;  %v2238_v46 = vld [vmem:[%s2828_s28 + $0x64] sm:$0xf] }
  0x93   : > { %1507 = vrot.lane.b32.xlu0 %v2363_v57, %s2718_s13  ;;  %v456_v5 = vrot.slane %v455_v61, 4  ;;  %v1165_v38 = vsel %vm2872_vm2, %v1163_v63, %v1164_v59  ;;  %v476_v6 = vshrl.u32 %v3283_v21, 16  ;;  %v482_v8 = vshll.u32 %v290_v55, 16 }
  0x94   : > { %v2371_v10 = vcombine.low %v1162_v62, %v1165_v38  ;;  %v465_v12 = vrot.slane %v463_v0, 4  ;;  %v468_v14 = vrot.slane %v466_v4, 5  ;;  %v474_v15 = vrot.slane %v472_v54, 5  ;;  %v2246_v0 = vld [vmem:[%s2828_s28 + $0x68] sm:$0x1] }
  0x95   : > { %v461_v3 = vsel %vm2919_vm5, %v456_v5, %v460_v49  ;;  %v478_v18 = vrot.slane %v476_v6, 4  ;;  %v484_v16 = vrot.slane %v482_v8, 5  ;;  %v2300_v27 = vrot.slane %v2292_v44, 9  ;;  %v3352_v6 = vld [vmem:[%s2828_s28 + $0x5c] sm:$0x1] }
  0x96   : > { %v2317_v7 = vcombine.low %v451_v51, %v461_v3  ;;  %v469_v9 = vor.u32 %v468_v14, %v465_v12  ;;  %v1168_v40 = vrot.slane %v3222_v43, 5  ;;  %v1171_v22 = vrot.slane %v3239_v2, 5  ;;  %v3313_v31 = vpop.permute.xlu1 %1333 }
  0x97   : > { %1547 = vrot.lane.b32.xlu0 %v2371_v10, %s2719_s14  ;;  %v479_v23 = vor.u32 %v478_v18, %v474_v15  ;;  %v2222_v24 = vrot.slane %v493_v1, 9  ;;  %v572_v29 = vrot.slane %v3283_v21, 5  ;;  %v575_v30 = vrot.slane %v290_v55, 5  ;;  %v3338_v52 = vpop.permute.xlu0 %1331 }
  0x98   : > { %1255 = vrot.lane.b32.xlu1 %v2317_v7, %s2716_s11  ;;  %v470_v33 = vrot.slane %v469_v9, 4  ;;  %v1169_v43 = vsel %vm2872_vm2, %v2300_v27, %v1168_v40  ;;  %v1170_v2 = vrot.slane %v1168_v40, 4  ;;  %v2221_v19 = vrot.slane %v492_v20, 9  ;;  %v2253_v40 = vld [vmem:[%s2828_s28 + $0x54] sm:$0xe] }
  0x99   : > { %v480_v45 = vrot.slane %v479_v23, 4  ;;  %v573_v34 = vsel %vm2872_vm2, %v2222_v24, %v572_v29  ;;  %v574_v53 = vrot.slane %v572_v29, 4  ;;  %v565_v11 = vrot.slane %v3258_v13, 5 }
  0x9a   : > { %v475_v36 = vsel %vm2919_vm5, %v470_v33, %v474_v15  ;;  %v1172_v25 = vsel %vm2872_vm2, %v1170_v2, %v1171_v22  ;;  %v568_v41 = vrot.slane %v3262_v32, 5  ;;  %v771_v60 = vshrl.u32 %v3311_v28, 16  ;;  %v3344_v4 = vpop.permute.xlu1 %1461  ;;  %v2254_v15 = vld [vmem:[%s2828_s28 + $0x60] sm:$0xe] }
  0x9b   : > { %v485_v48 = vsel %vm2919_vm5, %v480_v45, %v484_v16  ;;  %v2372_v49 = vcombine.low %v1169_v43, %v1172_v25  ;;  %v576_v17 = vsel %vm2872_vm2, %v574_v53, %v575_v30  ;;  %v566_v26 = vsel %vm2872_vm2, %v2221_v19, %v565_v11 }
  0x9c   : > { %v2318_v32 = vcombine.low %v475_v36, %v485_v48  ;;  %v2326_v59 = vcombine.low %v573_v34, %v576_v17  ;;  %v567_v55 = vrot.slane %v565_v11, 4  ;;  %v773_v57 = vrot.slane %v771_v60, 4  ;;  %v3359_v22 = vpop.permute.xlu0 %1459  ;;  %v3365_v36 = vld [vmem:[%s2828_s28 + $0x6c] sm:$0xf] }
  0x9d   : > { %1549 = vrot.lane.b32.xlu0 %v2372_v49, %s2719_s14  ;;  %v774_v61 = vshll.u32 %v3311_v28, 16  ;;  %v784_v62 = vshrl.u32 %v2238_v46, 16  ;;  %v2334_v63 = vcombine.low %v3311_v28, %v2238_v46  ;;  %v747_v51 = vshrl.u32 %v2235_v47, 16 }
  0x9e   : > { %1257 = vrot.lane.b32.xlu1 %v2318_v32, %s2716_s11  ;;  %v569_v54 = vsel %vm2872_vm2, %v567_v55, %v568_v41  ;;  %v750_v44 = vshll.u32 %v2235_v47, 16  ;;  %v760_v5 = vshrl.u32 %v3336_v35, 16  ;;  %v2333_v38 = vcombine.low %v2235_v47, %v3336_v35 }
  0x9f   : > { %v2325_v8 = vcombine.low %v566_v26, %v569_v54  ;;  %v776_v10 = vrot.slane %v774_v61, 5  ;;  %v749_v12 = vrot.slane %v747_v51, 4  ;;  %v780_v14 = vshll.u32 %v2238_v46, 16  ;;  %v2275_v61 = vld [vmem:[%s2828_s28 + $0x60] sm:$0xf] }
  0xa0   : > { %v752_v1 = vrot.slane %v750_v44, 5  ;;  %v786_v3 = vrot.slane %v784_v62, 4  ;;  %v790_v18 = vshll.u32 %v2246_v0, 16  ;;  %v756_v16 = vshll.u32 %v3336_v35, 16  ;;  %v3392_v54 = vld [vmem:[%s2828_s28 + $0x64] sm:$0xf] }
  0xa1   : > { %1295 = vrot.lane.b32.xlu0 %v2325_v8, %s2715_s8  ;;  %v777_v27 = vor.u32 %v776_v10, %v773_v57  ;;  %v782_v20 = vrot.slane %v780_v14, 5  ;;  %v762_v7 = vrot.slane %v760_v5, 4  ;;  %v766_v9 = vshll.u32 %v3352_v6, 16 }
  0xa2   : > { %1297 = vrot.lane.b32.xlu1 %v2326_v59, %s2715_s8  ;;  %v792_v23 = vrot.slane %v790_v18, 5  ;;  %v753_v24 = vor.u32 %v752_v1, %v749_v12  ;;  %v758_v29 = vrot.slane %v756_v16, 5  ;;  %v2262_v30 = vrot.slane %v2254_v15, 9  ;;  %v2278_v59 = vld [vmem:[%s2828_s28 + $0x70] sm:$0xf]  ;;  %v3385_v62 = vpop.permute.xlu0 %1411  ;;  %s2213_s8 = sshll.u32 %s2821_s10, 5 }
  0xa3   : > { %v778_v28 = vrot.slane %v777_v27, 4  ;;  %v787_v33 = vor.u32 %v786_v3, %v782_v20  ;;  %v768_v43 = vrot.slane %v766_v9, 5  ;;  %v877_v2 = vrot.slane %v2238_v46, 5  ;;  %v3362_v19 = vpop.permute.xlu1 %1283  ;;  %v2286_v1 = vld [vmem:[%s2828_s28 + $0x74] sm:$0x1]  ;;  %s3618_s10 = sand.u32 1, %s2686_s16  }
  0xa4   : > { %v754_v45 = vrot.slane %v753_v24, 4  ;;  %v763_v34 = vor.u32 %v762_v7, %v758_v29  ;;  %v880_v53 = vrot.slane %v2246_v0, 5  ;;  %v2261_v11 = vrot.slane %v2253_v40, 9  ;;  %v2294_v24 = vld [vmem:[%s2828_s28 + $0x6c] sm:$0xe] }
  0xa5   : > { %1343 = vrot.lane.b32.xlu0 %v2333_v38, %s2712_s5  ;;  %v783_v25 = vsel %vm2919_vm5, %v778_v28, %v782_v20  ;;  %v788_v41 = vrot.slane %v787_v33, 4  ;;  %v878_v60 = vsel %vm2872_vm2, %v2262_v30, %v877_v2  ;;  %v879_v46 = vrot.slane %v877_v2, 4  ;;  %v2285_v20 = vld [vmem:[%s2828_s28 + $0x68] sm:$0x1] }
  0xa6   : > { %1345 = vrot.lane.b32.xlu1 %v2334_v63, %s2712_s5  ;;  %v759_v47 = vsel %vm2919_vm5, %v754_v45, %v758_v29  ;;  %v764_v48 = vrot.slane %v763_v34, 4  ;;  %v870_v49 = vrot.slane %v3336_v35, 5  ;;  %v873_v17 = vrot.slane %v3352_v6, 5  ;;  %s2403_s5 = sshll.u32 %s2036_s27, 4  ;;  %s2720_s27 = smov [#allocation2]  }
  0xa7   : > { %v793_v26 = vsel %vm2919_vm5, %v788_v41, %v792_v23  ;;  %v881_v32 = vsel %vm2872_vm2, %v879_v46, %v880_v53  ;;  %v1076_v55 = vshrl.u32 %v3365_v36, 16  ;;  %v1079_v57 = vshll.u32 %v3365_v36, 16  ;;  %v3394_v44 = vpop.permute.xlu1 %1285  ;;  %v2293_v46 = vld [vmem:[%s2828_s28 + $0x60] sm:$0xe]  ;;  %s2592_s19 = sshll.u32 %s2720_s27, 4  ;;  %s2593_s19 = int_to_ptr.vmem [resolvable:$false] %s2592_s19 }
  0xa8   : > { %v2342_v63 = vcombine.low %v783_v25, %v793_v26  ;;  %v769_v35 = vsel %vm2919_vm5, %v764_v48, %v768_v43  ;;  %v2350_v51 = vcombine.low %v878_v60, %v881_v32  ;;  %v871_v0 = vsel %vm2872_vm2, %v2261_v11, %v870_v49 }
  0xa9   : > { %v2341_v5 = vcombine.low %v759_v47, %v769_v35  ;;  %v872_v38 = vrot.slane %v870_v49, 4  ;;  %v1078_v6 = vrot.slane %v1076_v55, 4  ;;  %v1081_v8 = vrot.slane %v1079_v57, 5 }
  0xaa   : > { %1385 = vrot.lane.b32.xlu1 %v2342_v63, %s2717_s12  ;;  %v1089_v10 = vshrl.u32 %v2278_v59, 16  ;;  %v2358_v12 = vcombine.low %v3365_v36, %v2278_v59  ;;  %v1052_v14 = vshrl.u32 %v2275_v61, 16  ;;  %v1055_v15 = vshll.u32 %v2275_v61, 16 }
  0xab   : > { %1383 = vrot.lane.b32.xlu0 %v2341_v5, %s2717_s12  ;;  %v874_v3 = vsel %vm2872_vm2, %v872_v38, %v873_v17  ;;  %v1065_v18 = vshrl.u32 %v3392_v54, 16  ;;  %v2357_v16 = vcombine.low %v2275_v61, %v3392_v54  ;;  %v1082_v27 = vor.u32 %v1081_v8, %v1078_v6  ;;  %v3408_v11 = vpop.permute.xlu1 %1413  ;;  %v2578_v6 = vld [vmem:[%s2828_s28 + $0x4] sm:$0xf]  ;;  %v2579_v8 = vld [vmem:[%s2828_s28] sm:$0xf] }
  0xac   : > { %v2349_v7 = vcombine.low %v871_v0, %v874_v3  ;;  %v1054_v9 = vrot.slane %v1052_v14, 4  ;;  %v1057_v40 = vrot.slane %v1055_v15, 5  ;;  %v1085_v23 = vshll.u32 %v2278_v59, 16 }
  0xad   : > { %v1083_v29 = vrot.slane %v1082_v27, 4  ;;  %v1091_v30 = vrot.slane %v1089_v10, 4  ;;  %v1095_v28 = vshll.u32 %v2286_v1, 16  ;;  %v1061_v33 = vshll.u32 %v3392_v54, 16  ;;  %v1244_v43 = vpop.permute.xlu0 %1243 }
  0xae   : > { %1425 = vrot.lane.b32.xlu1 %v2350_v51, %s2714_s7  ;;  %v1087_v2 = vrot.slane %v1085_v23, 5  ;;  %v1058_v45 = vor.u32 %v1057_v40, %v1054_v9  ;;  %v1067_v34 = vrot.slane %v1065_v18, 4  ;;  %v1071_v53 = vshll.u32 %v2285_v20, 16  ;;  %v2580_v9 = vld [vmem:[%s2828_s28 + $0x10] sm:$0xf] }
  0xaf   : > { %1423 = vrot.lane.b32.xlu0 %v2349_v7, %s2714_s7  ;;  %v1097_v36 = vrot.slane %v1095_v28, 5  ;;  %v1063_v25 = vrot.slane %v1061_v33, 5  ;;  %v2302_v41 = vrot.slane %v2294_v24, 9  ;;  %v1182_v60 = vrot.slane %v2278_v59, 5  ;;  %v2581_v40 = vld [vmem:[%s2828_s28 + $0xc] sm:$0xf] }
  0xb0   : > { %v1088_v47 = vsel %vm2919_vm5, %v1083_v29, %v1087_v2  ;;  %v1092_v48 = vor.u32 %v1091_v30, %v1087_v2  ;;  %v1059_v49 = vrot.slane %v1058_v45, 4  ;;  %v1073_v17 = vrot.slane %v1071_v53, 5  ;;  %v2570_v30 = vld [vmem:[%s3715_s1 + $0x8] sm:$0xff]  }
  0xb1   : > { %v1068_v26 = vor.u32 %v1067_v34, %v1063_v25  ;;  %v1183_v32 = vsel %vm2872_vm2, %v2302_v41, %v1182_v60  ;;  %v1184_v55 = vrot.slane %v1182_v60, 4  ;;  %v1185_v57 = vrot.slane %v2286_v1, 5  ;;  %v1246_v61 = vpop.permute.xlu0 %1245 }
  0xb2   : > { %1473 = vrot.lane.b32.xlu1 %v2358_v12, %s2713_s6  ;;  %v1093_v63 = vrot.slane %v1092_v48, 4  ;;  %v1064_v59 = vsel %vm2919_vm5, %v1059_v49, %v1063_v25  ;;  %v2301_v35 = vrot.slane %v2293_v46, 9  ;;  %v1175_v51 = vrot.slane %v3392_v54, 5  ;;  %v1374_v1 = vpop.permute.xlu1 %1373 }
  0xb3   : > { %1471 = vrot.lane.b32.xlu0 %v2357_v16, %s2713_s6  ;;  %v1069_v0 = vrot.slane %v1068_v26, 4  ;;  %v1186_v5 = vsel %vm2872_vm2, %v1184_v55, %v1185_v57  ;;  %v1178_v38 = vrot.slane %v2285_v20, 5  ;;  %v2303_v10 = vcombine.low %v2579_v8, %v2578_v6  ;;  %v2569_v16 = vld [vmem:[%s3715_s1 + $0x10] ss:$0 sps:$4 sm:$0x33]   ;;  %s236_s6 = scalar_lea.vmem [#allocation2], %s3618_s10 }
  0xb4   : > { %v1098_v12 = vsel %vm2919_vm5, %v1093_v63, %v1097_v36  ;;  %v2374_v14 = vcombine.low %v1183_v32, %v1186_v5  ;;  %v1176_v15 = vsel %vm2872_vm2, %v2301_v35, %v1175_v51  ;;  %v1177_v54 = vrot.slane %v1175_v51, 4  ;;  %2463 = vmatprep.subr.msk.bf16.mxu0 %vm1736_vm11, %v2569_v16  ;;  %2464 = vmatprep.subr.msk.bf16.mxu1 %vm1736_vm11, %v2569_v16  ;;  %v2582_v35 = vld [vmem:[%s2828_s28 + $0x18] sm:$0xf]  ;;  %v2583_v51 = vld [vmem:[%s2828_s28 + $0x1c] sm:$0xf]  ;;  %s2043_s7 = sshll.u32 %s236_s6, 4  ;;  %s3631_s7 = int_to_ptr.vmem [resolvable:$true] %s2043_s7 }
  0xb5   : > { %v2366_v3 = vcombine.low %v1088_v47, %v1098_v12  ;;  %v1074_v18 = vsel %vm2919_vm5, %v1069_v0, %v1073_v17  ;;  %v1558_v7 = vsel %vm1555_vm6, %v2303_v10, %v1244_v43  ;;  %v2304_v23 = vcombine.low %v2581_v40, %v2580_v9  ;;  %v1372_v24 = vpop.permute.xlu0 %1371  ;;  %v2584_v12 = vld [vmem:[%s2828_s28 + $0x24] sm:$0xf]  ;;  %s2588_s26 = scalar_lea.vmem %s3631_s7, 16  ;;  %p2595_p4 = scmp.lt.s32.totalorder %s3631_s7, %s2593_s19 }
  0xb6   : > { %v2365_v27 = vcombine.low %v1064_v59, %v1074_v18  ;;  %v1179_v20 = vsel %vm2872_vm2, %v1177_v54, %v1178_v38  ;;  %v1582_v29 = vsel %vm1580_vm7, %v1558_v7, %v3362_v19  ;;  %v1738_v43 = vsel %vm1736_vm11, %v2569_v16, 0  ;;  %p2589_p1 = scmp.ne.s32.totalorder %s3631_s7, %s2588_s26 }
  0xb7   : > { %1513 = vrot.lane.b32.xlu1 %v2366_v3, %s2718_s13  ;;  %v2373_v39 = vcombine.low %v1176_v15, %v1179_v20  ;;  %v1561_v37 = vsel %vm1555_vm6, %v2304_v23, %v1246_v61  ;;  %v1599_v28 = vsel %vm1597_vm8, %v1582_v29, %v3338_v52  ;;  %2436 = vmatpush3.bf16.msra.mxu0 %v1738_v43  ;;  %v2572_v52 = vld [vmem:[%s3715_s1] sm:$0xff]  }
  0xb8   : > { %1511 = vrot.lane.b32.xlu0 %v2365_v27, %s2718_s13  ;;  %v1584_v33 = vsel %vm1580_vm7, %v1561_v37, %v3394_v44  ;;  %v1616_v19 = vsel %vm1614_vm9, %v1599_v28, %v1372_v24  ;;  %v1502_v34 = vpop.permute.xlu1 %1501  ;;  %2460 = vmatpush3.bf16.msra.mxu1 %v1738_v43  ;;  %v2310_v36 = vcombine.low %v3277_v42, %v3283_v21  ;;  %p2590_p2 = pnand %p2589_p1, %p2800_p5 }
  0xb9   : > { %v1601_v2 = vsel %vm1597_vm8, %v1584_v33, %v3313_v31  ;;  %v1633_v45 = vsel %vm1631_vm10, %v1616_v19, %v3385_v62  ;;  %2437 = vmatprep.subr.bf16.mxu0 %v2570_v30  ;;  %2458 = vmatprep.subr.bf16.mxu1 %v2570_v30  ;;  %v2309_v62 = vcombine.low %v3251_v56, %v3258_v13 }
  0xba   : > { %v1618_v44 = vsel %vm1614_vm9, %v1601_v2, %v1374_v1  ;;  %v1650_v31 = vsel %vm1648_vm12, %v1633_v45, %v3359_v22  ;;  %v2305_v0 = vcombine.low %v2582_v35, %v2583_v51  ;;  %p2591_p3 = pneg %p2590_p2 }
  0xbb   : > { %1553 = vrot.lane.b32.xlu1 %v2374_v14, %s2719_s14  ;;  %2438 = vmatpush3.bf16.msra.mxu0 %v2570_v30  ;;  %v1635_v25 = vsel %vm1631_vm10, %v1618_v44, %v3408_v11  ;;  %v2585_v14 = vld [vmem:[%s2828_s28 + $0x28] sm:$0xf] }
  0xbc   : > { %1551 = vrot.lane.b32.xlu0 %v2373_v39, %s2719_s14  ;;  %v1500_v53 = vpop.permute.xlu0 %1499  ;;  %2461 = vmatpush3.bf16.msra.mxu1 %v2570_v30  ;;  %v1652_v47 = vsel %vm1648_vm12, %v1635_v25, %v3344_v4  ;;  %v2306_v15 = vcombine.low %v2584_v12, %v2585_v14  ;;  %v2586_v25 = vld [vmem:[%s2828_s28 + $0x30] sm:$0xf]  ;;  %s3637_s14 = scalar_lea.hbm %s3718_s4, %s2403_s5 }
  0xbd   : > { %2439 = vmatprep.subr.bf16.mxu0 %v2572_v52  ;;  %2459 = vmatprep.subr.bf16.mxu1 %v2572_v52  ;;  %v1667_v41 = vsel %vm1665_vm13, %v1650_v31, %v1500_v53  ;;  %v1669_v11 = vsel %vm1665_vm13, %v1652_v47, %v1502_v34 }
  0xbf   : > { %v1248_v60 = vpop.permute.xlu1 %1247  ;;  %2440 = vmatpush3.bf16.msra.mxu0 %v2572_v52 }
  0xc0   : > { %v1540_v22 = vpop.permute.xlu0 %1539  ;;  %2462 = vmatpush3.bf16.msra.mxu1 %v2572_v52  ;;  %v1564_v6 = vsel %vm1555_vm6, %v2305_v0, %v1248_v60 }
  0xc1   : > { %v1684_v46 = vsel %vm1682_vm14, %v1667_v41, %v1540_v22  ;;  %v2587_v41 = vld [vmem:[%s2828_s28 + $0x34] sm:$0xf]  ;;  %s2212_s28 = sshll.u32 %s2694_s18, 4 }
  0xc2   : > { %2441 = vmatprep.mubr.msk.bf16.mxu0 %vm1719_vm15, %v1684_v46  ;;  %v2307_v60 = vcombine.low %v2586_v25, %v2587_v41  ;;  %p255_p0 = scmp.lt.s32.totalorder %s2212_s28, 31 }
  0xc4   : > { %s3741_s28 = smov (!%p255_p0, %s2212_s28), 31 }
  0xc5   : > { %v1542_v48 = vpop.permute.xlu0 %1541  ;;  %s258_s11 = sadd.s32 %s2213_s8, %s3741_s28  ;;  %s3719_s28 = scalar_lea.vmem [#allocation4], %s3618_s10 }
  0xc6   : > { %v1250_v49 = vpop.permute.xlu1 %1249  ;;  %v1686_v17 = vsel %vm1682_vm14, %v1669_v11, %v1542_v48  ;;  %s2214_s12 = sshll.u32 %s258_s11, 2  ;;  %s2058_s8 = sshll.u32 %s3719_s28, 4  ;;  %s3639_s8 = int_to_ptr.vmem [resolvable:$true] %s2058_s8 }
  0xc7   : > { %2442 = vmatmul.mubr.msk.bf16.vlgmr.msra.gmra.mxu0 %vm1719_vm15, %v1686_v17  ;;  %v1567_v27 = vsel %vm1555_vm6, %v2306_v15, %v1250_v49  ;;  %v2308_v49 = vcombine.low %v3127_v50, %v3133_v58  ;;  %s3551_s23 = scalar_lea.vmem %s3716_s2, %s2214_s12  ;;  %s3629_s12 = scalar_lea.hbm %s3717_s3, %s2403_s5 }
  0xc8   : > { %s2594_s11 = scalar_lea.vmem %s2593_s19, 32 }
  0xc9   : > { %v1288_v26 = vpop.permute.xlu0 %1287  ;;  %p2596_p6 = scmp.lt.s32.totalorder %s2594_s11, %s2588_s26 }
  0xca   : > { %v1290_v32 = vpop.permute.xlu1 %1289  ;;  %v1586_v8 = vsel %vm1580_vm7, %v1564_v6, %v1288_v26 }
  0xcb   : > { %v1588_v9 = vsel %vm1580_vm7, %v1567_v27, %v1290_v32  ;;  %p2597_p8 = por %p2596_p6, %p2595_p4 }
  0xcd   : > { %v1336_v55 = vpop.permute.xlu0 %1335  ;;  %p2598_p9 = pnand %p2597_p8, %p2591_p3 }
  0xce   : > { %v1338_v4 = vpop.permute.xlu1 %1337  ;;  %v1603_v54 = vsel %vm1597_vm8, %v1586_v8, %v1336_v55 }
  0xcf   : > { %v1605_v24 = vsel %vm1597_vm8, %v1588_v9, %v1338_v4 }
  0xd2   : > { %v1378_v57 = vpop.permute.xlu1 %1377 }
  0xd3   : > { %v1376_v61 = vpop.permute.xlu0 %1375  ;;  %v1622_v39 = vsel %vm1614_vm9, %v1605_v24, %v1378_v57 }
  0xd4   : > { %v1620_v3 = vsel %vm1614_vm9, %v1603_v54, %v1376_v61 }
  0xd6   : > { %v1418_v63 = vpop.permute.xlu1 %1417 }
  0xd7   : > { %v1416_v59 = vpop.permute.xlu0 %1415  ;;  %v1639_v29 = vsel %vm1631_vm10, %v1622_v39, %v1418_v63 }
  0xd8   : > { %v1637_v18 = vsel %vm1631_vm10, %v1620_v3, %v1416_v59 }
  0xda   : > { %v1466_v5 = vpop.permute.xlu1 %1465 }
  0xdb   : > { %v1464_v38 = vpop.permute.xlu0 %1463  ;;  %v1656_v30 = vsel %vm1648_vm12, %v1639_v29, %v1466_v5 }
  0xdc   : > { %v1654_v16 = vsel %vm1648_vm12, %v1637_v18, %v1464_v38 }
  0xdf   : > { %v1506_v10 = vpop.permute.xlu1 %1505 }
  0xe0   : > { %v1504_v1 = vpop.permute.xlu0 %1503  ;;  %v1673_v37 = vsel %vm1665_vm13, %v1656_v30, %v1506_v10 }
  0xe1   : > { %v1671_v20 = vsel %vm1665_vm13, %v1654_v16, %v1504_v1 }
  0xe4   : > { %v1544_v7 = vpop.permute.xlu0 %1543 }
  0xe5   : > { %v1252_v40 = vpop.permute.xlu1 %1251  ;;  %v1688_v23 = vsel %vm1682_vm14, %v1671_v20, %v1544_v7 }
  0xe6   : > { %2445 = vmatprep.mubr.msk.bf16.mxu0 %vm1719_vm15, %v1688_v23  ;;  %v1570_v47 = vsel %vm1555_vm6, %v2307_v60, %v1252_v40 }
  0xea   : > { %v1546_v28 = vpop.permute.xlu0 %1545 }
  0xeb   : > { %v1254_v33 = vpop.permute.xlu1 %1253  ;;  %v1690_v19 = vsel %vm1682_vm14, %v1673_v37, %v1546_v28 }
  0xec   : > { %2446 = vmatmul.mubr.msk.bf16.gmra.mxu0 %vm1719_vm15, %v1690_v19  ;;  %v1573_v57 = vsel %vm1555_vm6, %v2308_v49, %v1254_v33 }
  0xee   : > { %v1292_v43 = vpop.permute.xlu0 %1291 }
  0xef   : > { %v1294_v2 = vpop.permute.xlu1 %1293  ;;  %v1590_v11 = vsel %vm1580_vm7, %v1570_v47, %v1292_v43 }
  0xf0   : > { %v1592_v59 = vsel %vm1580_vm7, %v1573_v57, %v1294_v2 }
  0xf2   : > { %v1340_v45 = vpop.permute.xlu0 %1339 }
  0xf3   : > { %v1342_v34 = vpop.permute.xlu1 %1341  ;;  %v1607_v17 = vsel %vm1597_vm8, %v1590_v11, %v1340_v45 }
  0xf4   : > { %v1609_v50 = vsel %vm1597_vm8, %v1592_v59, %v1342_v34 }
  0xf7   : > { %v1382_v52 = vpop.permute.xlu1 %1381 }
  0xf8   : > { %v1380_v44 = vpop.permute.xlu0 %1379  ;;  %v1626_v58 = vsel %vm1614_vm9, %v1609_v50, %v1382_v52 }
  0xf9   : > { %v1624_v32 = vsel %vm1614_vm9, %v1607_v17, %v1380_v44 }
  0xfb   : > { %v1422_v53 = vpop.permute.xlu1 %1421 }
  0xfc   : > { %v1420_v31 = vpop.permute.xlu0 %1419  ;;  %v1643_v0 = vsel %vm1631_vm10, %v1626_v58, %v1422_v53 }
  0xfd   : > { %v1641_v55 = vsel %vm1631_vm10, %v1624_v32, %v1420_v31 }
  0xff   : > { %v1470_v22 = vpop.permute.xlu1 %1469 }
 0x100   : > { %v1468_v46 = vpop.permute.xlu0 %1467  ;;  %v1660_v5 = vsel %vm1648_vm12, %v1643_v0, %v1470_v22 }
 0x101   : > { %v1658_v4 = vsel %vm1648_vm12, %v1641_v55, %v1468_v46 }
 0x104   : > { %v1510_v48 = vpop.permute.xlu1 %1509 }
 0x105   : > { %v1508_v26 = vpop.permute.xlu0 %1507  ;;  %v1677_v38 = vsel %vm1665_vm13, %v1660_v5, %v1510_v48 }
 0x106   : > { %v1675_v61 = vsel %vm1665_vm13, %v1658_v4, %v1508_v26 }
 0x109   : > { %v1548_v63 = vpop.permute.xlu0 %1547 }
 0x10a   : > { %v1256_v35 = vpop.permute.xlu1 %1255  ;;  %v1692_v51 = vsel %vm1682_vm14, %v1675_v61, %v1548_v63 }
 0x10b   : > { %2449 = vmatprep.mubr.msk.bf16.mxu1 %vm1719_vm15, %v1692_v51  ;;  %v1576_v9 = vsel %vm1555_vm6, %v2309_v62, %v1256_v35 }
 0x10f   : > { %v1550_v6 = vpop.permute.xlu0 %1549 }
 0x110   : > { %v1258_v8 = vpop.permute.xlu1 %1257  ;;  %v1694_v10 = vsel %vm1682_vm14, %v1677_v38, %v1550_v6 }
 0x111   : > { %2450 = vmatmul.mubr.msk.bf16.vlgmr.msra.gmra.mxu1 %vm1719_vm15, %v1694_v10  ;;  %v1579_v7 = vsel %vm1555_vm6, %v2310_v36, %v1258_v8 }
 0x113   : > { %v1296_v12 = vpop.permute.xlu0 %1295 }
 0x114   : > { %v1298_v14 = vpop.permute.xlu1 %1297  ;;  %v1594_v23 = vsel %vm1580_vm7, %v1576_v9, %v1296_v12 }
 0x115   : > { %v1596_v40 = vsel %vm1580_vm7, %v1579_v7, %v1298_v14 }
 0x117   : > { %v1344_v15 = vpop.permute.xlu0 %1343 }
 0x118   : > { %v1346_v54 = vpop.permute.xlu1 %1345  ;;  %v1611_v29 = vsel %vm1597_vm8, %v1594_v23, %v1344_v15 }
 0x119   : > { %v1613_v24 = vsel %vm1597_vm8, %v1596_v40, %v1346_v54 }
 0x11c   : > { %v1386_v1 = vpop.permute.xlu1 %1385 }
 0x11d   : > { %v1384_v3 = vpop.permute.xlu0 %1383  ;;  %v1630_v30 = vsel %vm1614_vm9, %v1613_v24, %v1386_v1 }
 0x11e   : > { %v1628_v21 = vsel %vm1614_vm9, %v1611_v29, %v1384_v3 }
 0x120   : > { %v1426_v18 = vpop.permute.xlu1 %1425 }
 0x121   : > { %v1424_v16 = vpop.permute.xlu0 %1423  ;;  %v1647_v56 = vsel %vm1631_vm10, %v1630_v30, %v1426_v18 }
 0x122   : > { %v1645_v13 = vsel %vm1631_vm10, %v1628_v21, %v1424_v16 }
 0x124   : > { %v1474_v27 = vpop.permute.xlu1 %1473 }
 0x125   : > { %v1472_v20 = vpop.permute.xlu0 %1471  ;;  %v1664_v62 = vsel %vm1648_vm12, %v1647_v56, %v1474_v27 }
 0x126   : > { %v1662_v36 = vsel %vm1648_vm12, %v1645_v13, %v1472_v20 }
 0x129   : > { %v1514_v39 = vpop.permute.xlu1 %1513 }
 0x12a   : > { %v1512_v42 = vpop.permute.xlu0 %1511  ;;  %v1681_v37 = vsel %vm1665_vm13, %v1664_v62, %v1514_v39 }
 0x12b   : > { %v1679_v33 = vsel %vm1665_vm13, %v1662_v36, %v1512_v42 }
 0x12d   : > { %v1554_v28 = vpop.permute.xlu1 %1553 }
 0x12e   : > { %v1698_v19 = vsel %vm1682_vm14, %v1681_v37, %v1554_v28  ;;  %v1552_v43 = vpop.permute.xlu0 %1551 }
 0x12f   : > { %v1696_v2 = vsel %vm1682_vm14, %v1679_v33, %v1552_v43 }
 0x130   : > { %2453 = vmatprep.mubr.msk.bf16.mxu1 %vm1719_vm15, %v1696_v2 }
 0x131   : > { %2454 = vmatmul.mubr.msk.bf16.gmra.mxu1 %vm1719_vm15, %v1698_v19 }
 0x187   : > { %v2443_v45 = vpop.f32.mrf.mxu0 }
 0x188   : > { %v2410_v34 = vpack.c.bf16 %v2443_v45, %v2443_v45  ;;  %v1959_v41 = vmul.f32 %v2443_v45, %v2443_v45  ;;  %v1921_v49 = vsel %vm1682_vm14, %v2443_v45, 0.0 }
 0x189   : > { %v1774_v52 = vpop.f32.mrf.mxu0 }
 0x18a   : > { %1904 = vst.msk [vmem:[%s3551_s23 + $0x8] sm:$0xf] %vm1901_vm0, %v2410_v34  ;;  %v2408_v44 = vpack.c.bf16 %v1774_v52, %v1774_v52  ;;  %v1957_v31 = vmul.f32 %v1774_v52, %v1774_v52  ;;  %v1918_v22 = vsel %vm1682_vm14, %v1774_v52, 0.0  ;;  %v1976_v57 = vsel %vm1682_vm14, %v1959_v41, 0.0 }
 0x18b   : > { %v2444_v53 = vpop.f32.mrf.mxu0 }
 0x18c   : > { %1902 = vst.msk [vmem:[%s3551_s23] sm:$0xf] %vm1901_vm0, %v2408_v44  ;;  %v2411_v25 = vpack.c.bf16 %v2444_v53, %v2444_v53  ;;  %v1973_v17 = vsel %vm1682_vm14, %v1957_v31, 0.0  ;;  %v1960_v26 = vmul.f32 %v2444_v53, %v2444_v53  ;;  %v1923_v61 = vsel %vm1682_vm14, %v2444_v53, 0.0 }
 0x18d   : > { %v1777_v60 = vpop.f32.mrf.mxu0 }
 0x18e   : > { %1905 = vst.msk [vmem:[%s3551_s23 + $0xc] sm:$0xf] %vm1901_vm0, %v2411_v25  ;;  %v2409_v46 = vpack.c.bf16 %v1777_v60, %v1777_v60  ;;  %v1919_v47 = vsel %vm1682_vm14, %v1777_v60, 0.0  ;;  %v1958_v11 = vmul.f32 %v1777_v60, %v1777_v60  ;;  %v1978_v35 = vsel %vm1682_vm14, %v1960_v26, 0.0 }
 0x18f   : > { %v1920_v48 = vadd.f32 %v1919_v47, %v1918_v22 }
 0x190   : > { %1903 = vst.msk [vmem:[%s3551_s23 + $0x4] sm:$0xf] %vm1901_vm0, %v2409_v46  ;;  %v1974_v32 = vsel %vm1682_vm14, %v1958_v11, 0.0 }
 0x191   : > { %v1922_v55 = vadd.f32 %v1921_v49, %v1920_v48  ;;  %v1975_v4 = vadd.f32 %v1974_v32, %v1973_v17 }
 0x193   : > { %v1977_v63 = vadd.f32 %v1976_v57, %v1975_v4  ;;  %v1924_v59 = vadd.f32 %v1923_v61, %v1922_v55 }
 0x195   : > { %v1979_v51 = vadd.f32 %v1978_v35, %v1977_v63 }
 0x1ac   : > { %v2447_v50 = vpop.f32.mrf.mxu0 }
 0x1ad   : > { %v2414_v58 = vpack.c.bf16 %v2447_v50, %v2447_v50  ;;  %v1963_v30 = vmul.f32 %v2447_v50, %v2447_v50  ;;  %v1929_v21 = vsel %vm1682_vm14, %v2447_v50, 0.0 }
 0x1ae   : > { %v1790_v0 = vpop.f32.mrf.mxu0 }
 0x1af   : > { %1908 = vst.msk [vmem:[%s3551_s23 + $0x18] sm:$0xf] %vm1901_vm0, %v2414_v58  ;;  %v2412_v5 = vpack.c.bf16 %v1790_v0, %v1790_v0  ;;  %v1961_v27 = vmul.f32 %v1790_v0, %v1790_v0  ;;  %v1925_v20 = vsel %vm1682_vm14, %v1790_v0, 0.0  ;;  %v1984_v13 = vsel %vm1682_vm14, %v1963_v30, 0.0 }
 0x1b0   : > { %v2448_v38 = vpop.f32.mrf.mxu0  ;;  %v1926_v23 = vadd.f32 %v1925_v20, %v1924_v59 }
 0x1b1   : > { %1906 = vst.msk [vmem:[%s3551_s23 + $0x10] sm:$0xf] %vm1901_vm0, %v2412_v5  ;;  %v2415_v6 = vpack.c.bf16 %v2448_v38, %v2448_v38  ;;  %v1980_v9 = vsel %vm1682_vm14, %v1961_v27, 0.0  ;;  %v1964_v62 = vmul.f32 %v2448_v38, %v2448_v38  ;;  %v1931_v28 = vsel %vm1682_vm14, %v2448_v38, 0.0 }
 0x1b2   : > { %v1793_v8 = vpop.f32.mrf.mxu0  ;;  %v1981_v39 = vadd.f32 %v1980_v9, %v1979_v51 }
 0x1b3   : > { %1909 = vst.msk [vmem:[%s3551_s23 + $0x1c] sm:$0xf] %vm1901_vm0, %v2415_v6  ;;  %v2413_v10 = vpack.c.bf16 %v1793_v8, %v1793_v8  ;;  %v1962_v7 = vmul.f32 %v1793_v8, %v1793_v8  ;;  %v1927_v40 = vsel %vm1682_vm14, %v1793_v8, 0.0  ;;  %v1986_v2 = vsel %vm1682_vm14, %v1964_v62, 0.0 }
 0x1b4   : > { %v1928_v29 = vadd.f32 %v1927_v40, %v1926_v23 }
 0x1b5   : > { %1907 = vst.msk [vmem:[%s3551_s23 + $0x14] sm:$0xf] %vm1901_vm0, %v2413_v10  ;;  %v1982_v24 = vsel %vm1682_vm14, %v1962_v7, 0.0 }
 0x1b6   : > { %v1983_v42 = vadd.f32 %v1982_v24, %v1981_v39  ;;  %v1930_v56 = vadd.f32 %v1929_v21, %v1928_v29 }
 0x1b8   : > { %v1985_v37 = vadd.f32 %v1984_v13, %v1983_v42  ;;  %v1932_v43 = vadd.f32 %v1931_v28, %v1930_v56 }
 0x1ba   : > { %v1987_v44 = vadd.f32 %v1986_v2, %v1985_v37 }
 0x1d1   : > { %v2451_v12 = vpop.f32.mrf.mxu1 }
 0x1d2   : > { %v2418_v14 = vpack.c.bf16 %v2451_v12, %v2451_v12  ;;  %v1967_v41 = vmul.f32 %v2451_v12, %v2451_v12  ;;  %v1937_v22 = vsel %vm1682_vm14, %v2451_v12, 0.0 }
 0x1d3   : > { %v1806_v15 = vpop.f32.mrf.mxu1 }
 0x1d4   : > { %1912 = vst.msk [vmem:[%s3551_s23 + $0x28] sm:$0xf] %vm1901_vm0, %v2418_v14  ;;  %v2416_v54 = vpack.c.bf16 %v1806_v15, %v1806_v15  ;;  %v1965_v36 = vmul.f32 %v1806_v15, %v1806_v15  ;;  %v1933_v33 = vsel %vm1682_vm14, %v1806_v15, 0.0  ;;  %v1992_v11 = vsel %vm1682_vm14, %v1967_v41, 0.0 }
 0x1d5   : > { %v2452_v1 = vpop.f32.mrf.mxu1  ;;  %v1934_v52 = vadd.f32 %v1933_v33, %v1932_v43 }
 0x1d6   : > { %1910 = vst.msk [vmem:[%s3551_s23 + $0x20] sm:$0xf] %vm1901_vm0, %v2416_v54  ;;  %v2419_v3 = vpack.c.bf16 %v2452_v1, %v2452_v1  ;;  %v1988_v45 = vsel %vm1682_vm14, %v1965_v36, 0.0  ;;  %v1968_v48 = vmul.f32 %v2452_v1, %v2452_v1  ;;  %v1939_v32 = vsel %vm1682_vm14, %v2452_v1, 0.0 }
 0x1d7   : > { %v1809_v18 = vpop.f32.mrf.mxu1  ;;  %v1989_v31 = vadd.f32 %v1988_v45, %v1987_v44 }
 0x1d8   : > { %1913 = vst.msk [vmem:[%s3551_s23 + $0x2c] sm:$0xf] %vm1901_vm0, %v2419_v3  ;;  %v2417_v16 = vpack.c.bf16 %v1809_v18, %v1809_v18  ;;  %v1966_v19 = vmul.f32 %v1809_v18, %v1809_v18  ;;  %v1935_v34 = vsel %vm1682_vm14, %v1809_v18, 0.0  ;;  %v1994_v59 = vsel %vm1682_vm14, %v1968_v48, 0.0 }
 0x1d9   : > { %v1936_v25 = vadd.f32 %v1935_v34, %v1934_v52 }
 0x1da   : > { %1911 = vst.msk [vmem:[%s3551_s23 + $0x24] sm:$0xf] %vm1901_vm0, %v2417_v16  ;;  %v1990_v53 = vsel %vm1682_vm14, %v1966_v19, 0.0 }
 0x1db   : > { %v1991_v60 = vadd.f32 %v1990_v53, %v1989_v31  ;;  %v1938_v46 = vadd.f32 %v1937_v22, %v1936_v25 }
 0x1dd   : > { %v1993_v17 = vadd.f32 %v1992_v11, %v1991_v60  ;;  %v1940_v61 = vadd.f32 %v1939_v32, %v1938_v46 }
 0x1df   : > { %v1995_v58 = vadd.f32 %v1994_v59, %v1993_v17 }
 0x1f1   : > { %v2455_v47 = vpop.f32.mrf.mxu1 }
 0x1f2   : > { %v2422_v49 = vpack.c.bf16 %v2455_v47, %v2455_v47  ;;  %v1971_v5 = vmul.f32 %v2455_v47, %v2455_v47  ;;  %v1945_v14 = vsel %vm1682_vm14, %v2455_v47, 0.0 }
 0x1f3   : > { %v1822_v26 = vpop.f32.mrf.mxu1 }
 0x1f4   : > { %1916 = vst.msk [vmem:[%s3551_s23 + $0x38] sm:$0xf] %vm1901_vm0, %v2422_v49  ;;  %v2420_v55 = vpack.c.bf16 %v1822_v26, %v1822_v26  ;;  %v1941_v4 = vsel %vm1682_vm14, %v1822_v26, 0.0  ;;  %v1969_v57 = vmul.f32 %v1822_v26, %v1822_v26  ;;  %v2000_v18 = vsel %vm1682_vm14, %v1971_v5, 0.0 }
 0x1f5   : > { %v2456_v63 = vpop.f32.mrf.mxu1  ;;  %v1942_v50 = vadd.f32 %v1941_v4, %v1940_v61 }
 0x1f6   : > { %1914 = vst.msk [vmem:[%s3551_s23 + $0x30] sm:$0xf] %vm1901_vm0, %v2420_v55  ;;  %v1996_v35 = vsel %vm1682_vm14, %v1969_v57, 0.0  ;;  %v2423_v51 = vpack.c.bf16 %v2456_v63, %v2456_v63  ;;  %v1972_v15 = vmul.f32 %v2456_v63, %v2456_v63  ;;  %v1947_v16 = vsel %vm1682_vm14, %v2456_v63, 0.0 }
 0x1f7   : > { %v1825_v0 = vpop.f32.mrf.mxu1  ;;  %v1997_v10 = vadd.f32 %v1996_v35, %v1995_v58 }
 0x1f8   : > { %1917 = vst.msk [vmem:[%s3551_s23 + $0x3c] sm:$0xf] %vm1901_vm0, %v2423_v51  ;;  %v2421_v38 = vpack.c.bf16 %v1825_v0, %v1825_v0  ;;  %v1943_v6 = vsel %vm1682_vm14, %v1825_v0, 0.0  ;;  %v1970_v8 = vmul.f32 %v1825_v0, %v1825_v0  ;;  %v2002_v7 = vsel %vm1682_vm14, %v1972_v15, 0.0 }
 0x1f9   : > { %v1944_v12 = vadd.f32 %v1943_v6, %v1942_v50 }
 0x1fa   : > { %1915 = vst.msk [vmem:[%s3551_s23 + $0x34] sm:$0xf] %vm1901_vm0, %v2421_v38  ;;  %v1998_v54 = vsel %vm1682_vm14, %v1970_v8, 0.0  ;;  %s2021_s23 = scalar_lea.sflag [#allocation3], %s3618_s10 }
 0x1fb   : > { %v1946_v1 = vadd.f32 %v1945_v14, %v1944_v12  ;;  %v1999_v3 = vadd.f32 %v1998_v54, %v1997_v10 }
 0x1fd   : > { %v1948_v27 = vadd.f32 %v1947_v16, %v1946_v1  ;;  %v2001_v20 = vadd.f32 %v2000_v18, %v1999_v3 }
 0x1ff   : > { %v1949_v9 = vrot.slane %v1948_v27, 4  ;;  %v2003_v40 = vadd.f32 %v2002_v7, %v2001_v20 }
 0x201   : > { %v1950_v23 = vadd.f32 %v1949_v9, %v1948_v27  ;;  %v2004_v24 = vrot.slane %v2003_v40, 4 }
 0x203   : > { %v1951_v39 = vrot.slane %v1950_v23, 2  ;;  %v2005_v29 = vadd.f32 %v2004_v24, %v2003_v40 }
 0x205   : > { %v1952_v30 = vadd.f32 %v1951_v39, %v1950_v23  ;;  %v2006_v42 = vrot.slane %v2005_v29, 2 }
 0x207   : > { %v1953_v21 = vrot.slane %v1952_v30, 1  ;;  %v2007_v56 = vadd.f32 %v2006_v42, %v2005_v29 }
 0x209   : > { %v1954_v13 = vadd.f32 %v1953_v21, %v1952_v30  ;;  %v2008_v62 = vrot.slane %v2007_v56, 1 }
 0x20b   : > { %1956 = vst.msk [vmem:[%s236_s6] sm:$0x1] %vm1955_vm1, %v1954_v13  ;;  %v2009_v36 = vadd.f32 %v2008_v62, %v2007_v56 }
 0x20c   : > { %2601 = shalt.err (!%p2598_p9)
}
 0x20d   : > { %s2602_s5 = scalar_lea.hbm %s3629_s12, 16  ;;  %s2606_s13 = scalar_lea.hbm %s3717_s3, 64 }
 0x20e   : > { %p2603_p10 = scmp.ne.s32.totalorder %s3629_s12, %s2602_s5  ;;  %p2607_p13 = scmp.lt.s32.totalorder %s3629_s12, %s3717_s3 }
 0x20f   : > { %p2608_p0 = scmp.lt.s32.totalorder %s2606_s13, %s2602_s5 }
 0x210   : > { %p2604_p11 = pnand %p2603_p10, %p2800_p5 }
 0x211   : > { %p2609_p1 = por %p2608_p0, %p2607_p13 }
 0x212   : > { %p2605_p12 = pneg %p2604_p11 }
 0x214   : > { %p2610_p2 = pnand %p2609_p1, %p2605_p12 }
 0x216   : > { %2613 = shalt.err (!%p2610_p2)
}
 0x217   : > { %2467 = dma.vmem_to_hbm [thread:$0]  (%p2800_p5), %s3631_s7, 16, %s3629_s12, %s2021_s23  }
 0x218   : > { %s3726_s26 = scalar_lea.vmem [#allocation4], %s3618_s10  ;;  %s2025_s28 = scalar_lea.sflag [#allocation5], %s3618_s10 }
 0x219   : > { %2010 = vst.msk [vmem:[%s3726_s26] sm:$0x1] %vm1955_vm1, %v2009_v36  ;;  %s2614_s19 = scalar_lea.vmem %s3639_s8, 16  ;;  %s2721_s11 = smov [#allocation4]  }
 0x21a   : > { %p2615_p3 = scmp.ne.s32.totalorder %s3639_s8, %s2614_s19  ;;  %s2618_s5 = sshll.u32 %s2721_s11, 4  ;;  %s2619_s5 = int_to_ptr.vmem [resolvable:$false] %s2618_s5 }
 0x21b   : > { %s2620_s6 = scalar_lea.vmem %s2619_s5, 32  ;;  %p2621_p8 = scmp.lt.s32.totalorder %s3639_s8, %s2619_s5 }
 0x21c   : > { %p2616_p4 = pnand %p2615_p3, %p2800_p5  ;;  %p2622_p9 = scmp.lt.s32.totalorder %s2620_s6, %s2614_s19 }
 0x21e   : > { %p2617_p6 = pneg %p2616_p4  ;;  %p2623_p10 = por %p2622_p9, %p2621_p8 }
 0x220   : > { %p2624_p11 = pnand %p2623_p10, %p2617_p6 }
 0x222   : > { %2627 = shalt.err (!%p2624_p11)
}
 0x223   : > { %s2628_s7 = scalar_lea.hbm %s3637_s14, 16  ;;  %s2632_s23 = scalar_lea.hbm %s3718_s4, 64 }
 0x224   : > { %p2629_p12 = scmp.ne.s32.totalorder %s3637_s14, %s2628_s7  ;;  %p2633_p1 = scmp.lt.s32.totalorder %s3637_s14, %s3718_s4 }
 0x225   : > { %p2634_p2 = scmp.lt.s32.totalorder %s2632_s23, %s2628_s7 }
 0x226   : > { %p2630_p13 = pnand %p2629_p12, %p2800_p5 }
 0x227   : > { %p2635_p3 = por %p2634_p2, %p2633_p1 }
 0x228   : > { %p2631_p0 = pneg %p2630_p13 }
 0x22a   : > { %p2636_p4 = pnand %p2635_p3, %p2631_p0 }
 0x22c   : > { %2639 = shalt.err (!%p2636_p4)
}
 0x22d   : > { %2468 = dma.vmem_to_hbm [thread:$0]  (%p2800_p5), %s3639_s8, 16, %s3637_s14, %s2025_s28  }
 0x22e PF: > { %p2478_p6 = scmp.ge.s32.totalorder %s2710_s22, 2  ;;  %s2082_s27 = sand.u32 1, %s2682_s15  }
 0x22f   : > { %s2083_s26 = scalar_lea.sflag [#allocation3], %s2082_s27 }
 0x230   : > { %p2472_p8 = pnand %p2478_p6, %p2806_p7 }
 0x232   : > { %p2473_p9 = pneg %p2472_p8 }
 0x234   : > { %2673 = dma.done.wait (%p2473_p9), %s2083_s26, 16  }
 0x235   : > { %2675 = vsyncadd (%p2473_p9), %s2083_s26, 4294967280  ;;  %s2091_s19 = scalar_lea.sflag [#allocation5], %s2082_s27 }
 0x236   : > { %2677 = dma.done.wait (%p2473_p9), %s2091_s19, 16  }
 0x237   : > { %2679 = vsyncadd (%p2473_p9), %s2091_s19, 4294967280  ;;  %s21_s22 = sadd.s32 1, %s2710_s22   ;;  %s3727_s15 = smov %s2686_s16 }
 0x238   : > { %p18_p10 = scmp.ge.s32.totalorder %s21_s22, 6   ;;  %s3728_s16 = smov %s2690_s17 }
 0x239   : > { %s3729_s17 = smov %s2816_s9  ;;  %s3730_s18 = smov %s2702_s20 }
 0x23a   : > { %s3731_s19 = smov %s2706_s21  ;;  %s3732_s20 = smov %s3735_s24 }
 0x23b   : > { %s3733_s21 = smov %s3739_s25  ;;  %20 = sbr.rel (!%p18_p10) target bundleno = 7 (0x7), region = 94 }
 0x240   :  { %2095 = vsyncpa [#allocation3], 1 }
 0x241   :  { %2097 = vsyncpa [#allocation3 + $0x1], 1 }
 0x242   :  { %2098 = vsyncpa [#allocation5], 1 }
 0x243   :  { %2100 = vsyncpa [#allocation5 + $0x1], 1 }

</bundles_post_ra>
